<compile_context>
chip_gen: v7x
topology: tpu7x:2x2x1
jax: 0.10.0
libtpu: 0.0.40
codegen_flags: <defaults>
</compile_context>

<pallas_src>
import math

import jax
import jax.numpy as jnp
from jax import lax
from jax.experimental import pallas as pl
from jax.experimental.pallas import tpu as pltpu

# ---------------- small DistilBERT-like config ----------------
VOCAB = 100       # vocab size
MAX_POS = 64      # max position embeddings
D = 32            # hidden size
H = 2             # attention heads
DH = D // H       # head dim
F = 64            # FFN intermediate size
LAYERS = 2        # encoder layers
NUM_CLASSES = 3
EPS = 1e-12
NEG_INF = -1e9
N_LAYER_PARAMS = 12   # packed params per encoder layer (wqkv, bqkv, wo, bo, g1, b1, w1, b1, w2, b2, g2, b2)


# ---------------- in-kernel helpers ----------------
def _layernorm(x, gamma, beta):
    mu = jnp.mean(x, axis=-1, keepdims=True)
    var = jnp.mean((x - mu) ** 2, axis=-1, keepdims=True)
    return (x - mu) * lax.rsqrt(var + EPS) * gamma + beta


def _gelu_tanh(x):
    # TODO(synk): DistilBERT uses exact erf-GELU; tanh approximation used here.
    c = math.sqrt(2.0 / math.pi)
    return 0.5 * x * (1.0 + jnp.tanh(c * (x + 0.044715 * x * x * x)))


# ---------------- fused forward kernel ----------------
def fused_forward_kernel(x_ref, mask_ref, emb_g_ref, emb_b_ref, *rest):
    """Entire SentimentModel forward (post-embedding-lookup) in one kernel.

    x_ref:    (B, S, D)  word + position embedding sum, f32
    mask_ref: (B, 1, S)  additive attention-mask bias (0 = keep, -1e9 = masked), f32
    rest:     N_LAYER_PARAMS * LAYERS encoder-layer param refs, fc_w, fc_b, o_ref
    """
    layer_refs = rest[:N_LAYER_PARAMS * LAYERS]
    fc_w_ref, fc_b_ref, o_ref = rest[N_LAYER_PARAMS * LAYERS:]

    B, S, _ = x_ref.shape
    BS = B * S

    mask_bias = mask_ref[...]                              # (B, 1, S) additive
    scale = jnp.float32(1.0 / math.sqrt(DH))

    # Embedding LayerNorm (dropout = identity at eval); fold batch into sublanes.
    x = _layernorm(x_ref[...].reshape(BS, D), emb_g_ref[...], emb_b_ref[...])  # (BS, D)

    for l in range(LAYERS):                                # static unroll over layers
        (wqkv, bqkv, wo, bo, g1, be1,
         w1, b1, w2, b2, g2, be2) = layer_refs[l * N_LAYER_PARAMS:
                                               (l + 1) * N_LAYER_PARAMS]

        # Fused Q/K/V projection: one MXU matmul -> (BS, 3D).
        qkv = jnp.dot(x, wqkv[...], preferred_element_type=jnp.float32) + bqkv[...]
        wo_arr = wo[...]                                   # (D, D)

        # Multi-head attention: batched over B via einsum, static head loop (H=2).
        # Output projection applied per head and summed -> no lane concat, no .T.
        attn_out = bo[...]                                 # (1, D), broadcasts over rows
        for h in range(H):
            qh = (qkv[:, h * DH:(h + 1) * DH] * scale).reshape(B, S, DH)
            kh = qkv[:, D + h * DH:D + (h + 1) * DH].reshape(B, S, DH)
            vh = qkv[:, 2 * D + h * DH:2 * D + (h + 1) * DH].reshape(B, S, DH)

            sc = jnp.einsum('bqd,bkd->bqk', qh, kh,
                            preferred_element_type=jnp.float32) + mask_bias     # (B, S, S)
            sc = sc - jnp.max(sc, axis=-1, keepdims=True)
            p = jnp.exp(sc)
            p = p * pl.reciprocal(jnp.sum(p, axis=-1, keepdims=True), approx=True)
            ctx_h = jnp.einsum('bqk,bkd->bqd', p, vh,
                               preferred_element_type=jnp.float32)               # (B, S, DH)
            attn_out = attn_out + jnp.dot(ctx_h.reshape(BS, DH),
                                          wo_arr[h * DH:(h + 1) * DH, :],
                                          preferred_element_type=jnp.float32)    # (BS, D)

        x1 = _layernorm(x + attn_out, g1[...], be1[...])                          # (BS, D)

        hdn = _gelu_tanh(jnp.dot(x1, w1[...],
                                 preferred_element_type=jnp.float32) + b1[...])   # (BS, F)
        ffn = jnp.dot(hdn, w2[...], preferred_element_type=jnp.float32) + b2[...]
        x = _layernorm(x1 + ffn, g2[...], be2[...])                               # (BS, D)

    # CLS pooling + classifier epilogue: outputs.last_hidden_state[:, 0, :] @ fc
    cls = x.reshape(B, S, D)[:, 0, :]                                             # (B, D)
    o_ref[...] = jnp.dot(cls, fc_w_ref[...],
                         preferred_element_type=jnp.float32) + fc_b_ref[...]


# ---------------- wrapper (single pallas_call, no grid) ----------------
def sentiment_model_forward(params, input_ids, attention_mask):
    B, S = input_ids.shape

    # Embeddings: word + position (gather kept in JAX glue).
    x = jnp.take(params["word_emb"], input_ids, axis=0) \
        + params["pos_emb"][:S][None, :, :]
    # Additive attention-mask bias: 0 for keep, NEG_INF for masked keys.
    mask_bias = jnp.where(attention_mask > 0,
                          jnp.float32(0.0), jnp.float32(NEG_INF)).reshape(B, 1, S)

    # Pack layer params; fuse Q/K/V weights into one (D, 3D) matrix per layer.
    flat_layer_params = []
    for (wq, bq, wk, bk, wv, bv, wo, bo, g1, be1,
         w1, b1, w2, b2, g2, be2) in params["layers"]:
        wqkv = jnp.concatenate([wq, wk, wv], axis=1)        # (D, 3D)
        bqkv = jnp.concatenate([bq, bk, bv], axis=1)        # (1, 3D)
        flat_layer_params += [wqkv, bqkv, wo, bo, g1, be1, w1, b1, w2, b2, g2, be2]

    inputs = [x, mask_bias, params["emb_ln_g"], params["emb_ln_b"],
              *flat_layer_params, params["fc_w"], params["fc_b"]]

    vmem = pl.BlockSpec(memory_space=pltpu.MemorySpace.VMEM)
    return pl.pallas_call(
        fused_forward_kernel,
        out_shape=jax.ShapeDtypeStruct((B, NUM_CLASSES), jnp.float32),
        in_specs=[vmem] * len(inputs),
        out_specs=vmem,
    )(*inputs)


sentiment_model_forward_jit = jax.jit(sentiment_model_forward)


# ---------------- parameter init (deterministic, synthetic) ----------------
def init_model(key):
    std = 0.02
    keys = jax.random.split(key, 3 + LAYERS)
    params = {
        "word_emb": jax.random.normal(keys[0], (VOCAB, D), jnp.float32) * std,
        "pos_emb": jax.random.normal(keys[1], (MAX_POS, D), jnp.float32) * std,
        "emb_ln_g": jnp.ones((1, D), jnp.float32),
        "emb_ln_b": jnp.zeros((1, D), jnp.float32),
        "layers": [],
    }
    for l in range(LAYERS):
        lk = jax.random.split(keys[2 + l], 6)
        layer = (
            jax.random.normal(lk[0], (D, D), jnp.float32) * std,   # wq
            jnp.zeros((1, D), jnp.float32),                        # bq
            jax.random.normal(lk[1], (D, D), jnp.float32) * std,   # wk
            jnp.zeros((1, D), jnp.float32),                        # bk
            jax.random.normal(lk[2], (D, D), jnp.float32) * std,   # wv
            jnp.zeros((1, D), jnp.float32),                        # bv
            jax.random.normal(lk[3], (D, D), jnp.float32) * std,   # wo
            jnp.zeros((1, D), jnp.float32),                        # bo
            jnp.ones((1, D), jnp.float32),                         # ln1 gamma
            jnp.zeros((1, D), jnp.float32),                        # ln1 beta
            jax.random.normal(lk[4], (D, F), jnp.float32) * std,   # w1 (ffn in)
            jnp.zeros((1, F), jnp.float32),                        # b1
            jax.random.normal(lk[5], (F, D), jnp.float32) * std,   # w2 (ffn out)
            jnp.zeros((1, D), jnp.float32),                        # b2
            jnp.ones((1, D), jnp.float32),                         # ln2 gamma
            jnp.zeros((1, D), jnp.float32),                        # ln2 beta
        )
        params["layers"].append(layer)
    params["fc_w"] = jax.random.normal(keys[-1], (D, NUM_CLASSES), jnp.float32) * std
    params["fc_b"] = jnp.zeros((1, NUM_CLASSES), jnp.float32)
    return params


if __name__ == "__main__":
    key = jax.random.PRNGKey(0)
    pkey, dkey = jax.random.split(key)
    params = init_model(pkey)

    B, S = 2, 8
    input_ids = jax.random.randint(dkey, (B, S), 0, VOCAB, dtype=jnp.int32)
    attention_mask = jnp.ones((B, S), jnp.int32).at[1, 6:].set(0)  # pad last 2 of row 1

    logits = sentiment_model_forward_jit(params, input_ids, attention_mask)
    logits = jax.block_until_ready(logits)

    assert logits.shape == (B, NUM_CLASSES)
    assert bool(jnp.all(jnp.isfinite(logits)))
    print("KERNEL_OK")
</pallas_src>

<mosaic_0001>
module attributes {stable_mosaic.version = 11 : i64} {
  func.func @fused_forward_kernel(%arg0: memref<2x8x32xf32, #tpu.memory_space<vmem>>, %arg1: memref<2x1x8xf32, #tpu.memory_space<vmem>>, %arg2: memref<1x32xf32, #tpu.memory_space<vmem>>, %arg3: memref<1x32xf32, #tpu.memory_space<vmem>>, %arg4: memref<32x96xf32, #tpu.memory_space<vmem>>, %arg5: memref<1x96xf32, #tpu.memory_space<vmem>>, %arg6: memref<32x32xf32, #tpu.memory_space<vmem>>, %arg7: memref<1x32xf32, #tpu.memory_space<vmem>>, %arg8: memref<1x32xf32, #tpu.memory_space<vmem>>, %arg9: memref<1x32xf32, #tpu.memory_space<vmem>>, %arg10: memref<32x64xf32, #tpu.memory_space<vmem>>, %arg11: memref<1x64xf32, #tpu.memory_space<vmem>>, %arg12: memref<64x32xf32, #tpu.memory_space<vmem>>, %arg13: memref<1x32xf32, #tpu.memory_space<vmem>>, %arg14: memref<1x32xf32, #tpu.memory_space<vmem>>, %arg15: memref<1x32xf32, #tpu.memory_space<vmem>>, %arg16: memref<32x96xf32, #tpu.memory_space<vmem>>, %arg17: memref<1x96xf32, #tpu.memory_space<vmem>>, %arg18: memref<32x32xf32, #tpu.memory_space<vmem>>, %arg19: memref<1x32xf32, #tpu.memory_space<vmem>>, %arg20: memref<1x32xf32, #tpu.memory_space<vmem>>, %arg21: memref<1x32xf32, #tpu.memory_space<vmem>>, %arg22: memref<32x64xf32, #tpu.memory_space<vmem>>, %arg23: memref<1x64xf32, #tpu.memory_space<vmem>>, %arg24: memref<64x32xf32, #tpu.memory_space<vmem>>, %arg25: memref<1x32xf32, #tpu.memory_space<vmem>>, %arg26: memref<1x32xf32, #tpu.memory_space<vmem>>, %arg27: memref<1x32xf32, #tpu.memory_space<vmem>>, %arg28: memref<32x3xf32, #tpu.memory_space<vmem>>, %arg29: memref<1x3xf32, #tpu.memory_space<vmem>>, %arg30: memref<2x3xf32, #tpu.memory_space<vmem>>) attributes {dimension_semantics = [], scalar_prefetch = 0 : i64, scratch_operands = 0 : i64, tpu.core_type = #tpu.core_type<tc>} {
    %c0 = arith.constant 0 : index
    %c0_0 = arith.constant 0 : index
    %c0_1 = arith.constant 0 : index
    %0 = vector.load %arg1[%c0, %c0_0, %c0_1] : memref<2x1x8xf32, #tpu.memory_space<vmem>>, vector<2x1x8xf32>
    %c0_2 = arith.constant 0 : index
    %c0_3 = arith.constant 0 : index
    %c0_4 = arith.constant 0 : index
    %1 = vector.load %arg0[%c0_2, %c0_3, %c0_4] : memref<2x8x32xf32, #tpu.memory_space<vmem>>, vector<2x8x32xf32>
    %2 = vector.shape_cast %1 : vector<2x8x32xf32> to vector<16x32xf32>
    %c0_5 = arith.constant 0 : index
    %c0_6 = arith.constant 0 : index
    %3 = vector.load %arg2[%c0_5, %c0_6] : memref<1x32xf32, #tpu.memory_space<vmem>>, vector<1x32xf32>
    %c0_7 = arith.constant 0 : index
    %c0_8 = arith.constant 0 : index
    %4 = vector.load %arg3[%c0_7, %c0_8] : memref<1x32xf32, #tpu.memory_space<vmem>>, vector<1x32xf32>
    %cst = arith.constant dense<0.000000e+00> : vector<16xf32>
    %5 = vector.multi_reduction <add>, %2, %cst [1] : vector<16x32xf32> to vector<16xf32>
    %6 = vector.shape_cast %5 : vector<16xf32> to vector<16x1xf32>
    %cst_9 = arith.constant 3.200000e+01 : f32
    %7 = vector.broadcast %cst_9 : f32 to vector<16x1xf32>
    %8 = arith.divf %6, %7 : vector<16x1xf32>
    %9 = vector.broadcast %8 : vector<16x1xf32> to vector<16x32xf32>
    %10 = arith.subf %2, %9 : vector<16x32xf32>
    %11 = arith.mulf %10, %10 : vector<16x32xf32>
    %cst_10 = arith.constant dense<0.000000e+00> : vector<16xf32>
    %12 = vector.multi_reduction <add>, %11, %cst_10 [1] : vector<16x32xf32> to vector<16xf32>
    %13 = vector.shape_cast %12 : vector<16xf32> to vector<16x1xf32>
    %cst_11 = arith.constant 3.200000e+01 : f32
    %14 = vector.broadcast %cst_11 : f32 to vector<16x1xf32>
    %15 = arith.divf %13, %14 : vector<16x1xf32>
    %16 = vector.broadcast %8 : vector<16x1xf32> to vector<16x32xf32>
    %17 = arith.subf %2, %16 : vector<16x32xf32>
    %cst_12 = arith.constant 9.99999996E-13 : f32
    %18 = vector.broadcast %cst_12 : f32 to vector<16x1xf32>
    %19 = arith.addf %15, %18 : vector<16x1xf32>
    %20 = math.rsqrt %19 : vector<16x1xf32>
    %21 = vector.broadcast %20 : vector<16x1xf32> to vector<16x32xf32>
    %22 = arith.mulf %17, %21 : vector<16x32xf32>
    %23 = vector.broadcast %3 : vector<1x32xf32> to vector<16x32xf32>
    %24 = arith.mulf %22, %23 : vector<16x32xf32>
    %25 = vector.broadcast %4 : vector<1x32xf32> to vector<16x32xf32>
    %26 = arith.addf %24, %25 : vector<16x32xf32>
    %c0_13 = arith.constant 0 : index
    %c0_14 = arith.constant 0 : index
    %27 = vector.load %arg4[%c0_13, %c0_14] : memref<32x96xf32, #tpu.memory_space<vmem>>, vector<32x96xf32>
    %cst_15 = arith.constant dense<0.000000e+00> : vector<16x96xf32>
    %28 = tpu.matmul %26, %27, %cst_15 {dimension_numbers = #tpu.dot_dimension_numbers<[1], [0], [0], [1], [0, 0, 1, 1], [], []>} : vector<16x32xf32>, vector<32x96xf32>, vector<16x96xf32> -> vector<16x96xf32>
    %c0_16 = arith.constant 0 : index
    %c0_17 = arith.constant 0 : index
    %29 = vector.load %arg5[%c0_16, %c0_17] : memref<1x96xf32, #tpu.memory_space<vmem>>, vector<1x96xf32>
    %30 = vector.broadcast %29 : vector<1x96xf32> to vector<16x96xf32>
    %31 = arith.addf %28, %30 : vector<16x96xf32>
    %c0_18 = arith.constant 0 : index
    %c0_19 = arith.constant 0 : index
    %32 = vector.load %arg6[%c0_18, %c0_19] : memref<32x32xf32, #tpu.memory_space<vmem>>, vector<32x32xf32>
    %c0_20 = arith.constant 0 : index
    %c0_21 = arith.constant 0 : index
    %33 = vector.load %arg7[%c0_20, %c0_21] : memref<1x32xf32, #tpu.memory_space<vmem>>, vector<1x32xf32>
    %34 = vector.extract_strided_slice %31 {offsets = [0, 0], sizes = [16, 16], strides = [1, 1]} : vector<16x96xf32> to vector<16x16xf32>
    %cst_22 = arith.constant 2.500000e-01 : f32
    %35 = vector.broadcast %cst_22 : f32 to vector<16x16xf32>
    %36 = arith.mulf %34, %35 : vector<16x16xf32>
    %37 = vector.shape_cast %36 : vector<16x16xf32> to vector<2x8x16xf32>
    %38 = vector.extract_strided_slice %31 {offsets = [0, 32], sizes = [16, 16], strides = [1, 1]} : vector<16x96xf32> to vector<16x16xf32>
    %39 = vector.shape_cast %38 : vector<16x16xf32> to vector<2x8x16xf32>
    %40 = vector.extract_strided_slice %31 {offsets = [0, 64], sizes = [16, 16], strides = [1, 1]} : vector<16x96xf32> to vector<16x16xf32>
    %41 = vector.shape_cast %40 : vector<16x16xf32> to vector<2x8x16xf32>
    "tpu.trace_start"() <{level = 10 : i32, message = "bqd,bkd->bqk"}> : () -> ()
    %cst_23 = arith.constant dense<0.000000e+00> : vector<2x8x8xf32>
    %42 = tpu.matmul %37, %39, %cst_23 {dimension_numbers = #tpu.dot_dimension_numbers<[2], [2], [1], [1], [0, 0, 0, 1, 1, 1], [0], [0]>} : vector<2x8x16xf32>, vector<2x8x16xf32>, vector<2x8x8xf32> -> vector<2x8x8xf32>
    "tpu.trace_stop"() : () -> ()
    %43 = vector.broadcast %0 : vector<2x1x8xf32> to vector<2x8x8xf32>
    %44 = arith.addf %42, %43 : vector<2x8x8xf32>
    %cst_24 = arith.constant dense<0xFF800000> : vector<2x8xf32>
    %45 = vector.multi_reduction <maximumf>, %44, %cst_24 [2] : vector<2x8x8xf32> to vector<2x8xf32>
    %46 = vector.shape_cast %45 : vector<2x8xf32> to vector<2x8x1xf32>
    %47 = vector.broadcast %46 : vector<2x8x1xf32> to vector<2x8x8xf32>
    %48 = arith.subf %44, %47 : vector<2x8x8xf32>
    %49 = math.exp %48 : vector<2x8x8xf32>
    %cst_25 = arith.constant dense<0.000000e+00> : vector<2x8xf32>
    %50 = vector.multi_reduction <add>, %49, %cst_25 [2] : vector<2x8x8xf32> to vector<2x8xf32>
    %51 = vector.shape_cast %50 : vector<2x8xf32> to vector<2x8x1xf32>
    %52 = tpu.reciprocal %51 {approx = true} : vector<2x8x1xf32> -> vector<2x8x1xf32>
    %53 = vector.broadcast %52 : vector<2x8x1xf32> to vector<2x8x8xf32>
    %54 = arith.mulf %49, %53 : vector<2x8x8xf32>
    "tpu.trace_start"() <{level = 10 : i32, message = "bqk,bkd->bqd"}> : () -> ()
    %cst_26 = arith.constant dense<0.000000e+00> : vector<2x8x16xf32>
    %55 = tpu.matmul %54, %41, %cst_26 {dimension_numbers = #tpu.dot_dimension_numbers<[2], [1], [1], [2], [0, 0, 0, 1, 1, 2], [0], [0]>} : vector<2x8x8xf32>, vector<2x8x16xf32>, vector<2x8x16xf32> -> vector<2x8x16xf32>
    "tpu.trace_stop"() : () -> ()
    %56 = vector.shape_cast %55 : vector<2x8x16xf32> to vector<16x16xf32>
    %57 = vector.extract_strided_slice %32 {offsets = [0, 0], sizes = [16, 32], strides = [1, 1]} : vector<32x32xf32> to vector<16x32xf32>
    %cst_27 = arith.constant dense<0.000000e+00> : vector<16x32xf32>
    %58 = tpu.matmul %56, %57, %cst_27 {dimension_numbers = #tpu.dot_dimension_numbers<[1], [0], [0], [1], [0, 0, 1, 1], [], []>} : vector<16x16xf32>, vector<16x32xf32>, vector<16x32xf32> -> vector<16x32xf32>
    %59 = vector.broadcast %33 : vector<1x32xf32> to vector<16x32xf32>
    %60 = arith.addf %59, %58 : vector<16x32xf32>
    %61 = vector.extract_strided_slice %31 {offsets = [0, 16], sizes = [16, 16], strides = [1, 1]} : vector<16x96xf32> to vector<16x16xf32>
    %cst_28 = arith.constant 2.500000e-01 : f32
    %62 = vector.broadcast %cst_28 : f32 to vector<16x16xf32>
    %63 = arith.mulf %61, %62 : vector<16x16xf32>
    %64 = vector.shape_cast %63 : vector<16x16xf32> to vector<2x8x16xf32>
    %65 = vector.extract_strided_slice %31 {offsets = [0, 48], sizes = [16, 16], strides = [1, 1]} : vector<16x96xf32> to vector<16x16xf32>
    %66 = vector.shape_cast %65 : vector<16x16xf32> to vector<2x8x16xf32>
    %67 = vector.extract_strided_slice %31 {offsets = [0, 80], sizes = [16, 16], strides = [1, 1]} : vector<16x96xf32> to vector<16x16xf32>
    %68 = vector.shape_cast %67 : vector<16x16xf32> to vector<2x8x16xf32>
    "tpu.trace_start"() <{level = 10 : i32, message = "bqd,bkd->bqk"}> : () -> ()
    %cst_29 = arith.constant dense<0.000000e+00> : vector<2x8x8xf32>
    %69 = tpu.matmul %64, %66, %cst_29 {dimension_numbers = #tpu.dot_dimension_numbers<[2], [2], [1], [1], [0, 0, 0, 1, 1, 1], [0], [0]>} : vector<2x8x16xf32>, vector<2x8x16xf32>, vector<2x8x8xf32> -> vector<2x8x8xf32>
    "tpu.trace_stop"() : () -> ()
    %70 = vector.broadcast %0 : vector<2x1x8xf32> to vector<2x8x8xf32>
    %71 = arith.addf %69, %70 : vector<2x8x8xf32>
    %cst_30 = arith.constant dense<0xFF800000> : vector<2x8xf32>
    %72 = vector.multi_reduction <maximumf>, %71, %cst_30 [2] : vector<2x8x8xf32> to vector<2x8xf32>
    %73 = vector.shape_cast %72 : vector<2x8xf32> to vector<2x8x1xf32>
    %74 = vector.broadcast %73 : vector<2x8x1xf32> to vector<2x8x8xf32>
    %75 = arith.subf %71, %74 : vector<2x8x8xf32>
    %76 = math.exp %75 : vector<2x8x8xf32>
    %cst_31 = arith.constant dense<0.000000e+00> : vector<2x8xf32>
    %77 = vector.multi_reduction <add>, %76, %cst_31 [2] : vector<2x8x8xf32> to vector<2x8xf32>
    %78 = vector.shape_cast %77 : vector<2x8xf32> to vector<2x8x1xf32>
    %79 = tpu.reciprocal %78 {approx = true} : vector<2x8x1xf32> -> vector<2x8x1xf32>
    %80 = vector.broadcast %79 : vector<2x8x1xf32> to vector<2x8x8xf32>
    %81 = arith.mulf %76, %80 : vector<2x8x8xf32>
    "tpu.trace_start"() <{level = 10 : i32, message = "bqk,bkd->bqd"}> : () -> ()
    %cst_32 = arith.constant dense<0.000000e+00> : vector<2x8x16xf32>
    %82 = tpu.matmul %81, %68, %cst_32 {dimension_numbers = #tpu.dot_dimension_numbers<[2], [1], [1], [2], [0, 0, 0, 1, 1, 2], [0], [0]>} : vector<2x8x8xf32>, vector<2x8x16xf32>, vector<2x8x16xf32> -> vector<2x8x16xf32>
    "tpu.trace_stop"() : () -> ()
    %83 = vector.shape_cast %82 : vector<2x8x16xf32> to vector<16x16xf32>
    %84 = vector.extract_strided_slice %32 {offsets = [16, 0], sizes = [16, 32], strides = [1, 1]} : vector<32x32xf32> to vector<16x32xf32>
    %cst_33 = arith.constant dense<0.000000e+00> : vector<16x32xf32>
    %85 = tpu.matmul %83, %84, %cst_33 {dimension_numbers = #tpu.dot_dimension_numbers<[1], [0], [0], [1], [0, 0, 1, 1], [], []>} : vector<16x16xf32>, vector<16x32xf32>, vector<16x32xf32> -> vector<16x32xf32>
    %86 = arith.addf %60, %85 : vector<16x32xf32>
    %87 = arith.addf %26, %86 : vector<16x32xf32>
    %c0_34 = arith.constant 0 : index
    %c0_35 = arith.constant 0 : index
    %88 = vector.load %arg8[%c0_34, %c0_35] : memref<1x32xf32, #tpu.memory_space<vmem>>, vector<1x32xf32>
    %c0_36 = arith.constant 0 : index
    %c0_37 = arith.constant 0 : index
    %89 = vector.load %arg9[%c0_36, %c0_37] : memref<1x32xf32, #tpu.memory_space<vmem>>, vector<1x32xf32>
    %cst_38 = arith.constant dense<0.000000e+00> : vector<16xf32>
    %90 = vector.multi_reduction <add>, %87, %cst_38 [1] : vector<16x32xf32> to vector<16xf32>
    %91 = vector.shape_cast %90 : vector<16xf32> to vector<16x1xf32>
    %cst_39 = arith.constant 3.200000e+01 : f32
    %92 = vector.broadcast %cst_39 : f32 to vector<16x1xf32>
    %93 = arith.divf %91, %92 : vector<16x1xf32>
    %94 = vector.broadcast %93 : vector<16x1xf32> to vector<16x32xf32>
    %95 = arith.subf %87, %94 : vector<16x32xf32>
    %96 = arith.mulf %95, %95 : vector<16x32xf32>
    %cst_40 = arith.constant dense<0.000000e+00> : vector<16xf32>
    %97 = vector.multi_reduction <add>, %96, %cst_40 [1] : vector<16x32xf32> to vector<16xf32>
    %98 = vector.shape_cast %97 : vector<16xf32> to vector<16x1xf32>
    %cst_41 = arith.constant 3.200000e+01 : f32
    %99 = vector.broadcast %cst_41 : f32 to vector<16x1xf32>
    %100 = arith.divf %98, %99 : vector<16x1xf32>
    %101 = vector.broadcast %93 : vector<16x1xf32> to vector<16x32xf32>
    %102 = arith.subf %87, %101 : vector<16x32xf32>
    %cst_42 = arith.constant 9.99999996E-13 : f32
    %103 = vector.broadcast %cst_42 : f32 to vector<16x1xf32>
    %104 = arith.addf %100, %103 : vector<16x1xf32>
    %105 = math.rsqrt %104 : vector<16x1xf32>
    %106 = vector.broadcast %105 : vector<16x1xf32> to vector<16x32xf32>
    %107 = arith.mulf %102, %106 : vector<16x32xf32>
    %108 = vector.broadcast %88 : vector<1x32xf32> to vector<16x32xf32>
    %109 = arith.mulf %107, %108 : vector<16x32xf32>
    %110 = vector.broadcast %89 : vector<1x32xf32> to vector<16x32xf32>
    %111 = arith.addf %109, %110 : vector<16x32xf32>
    %c0_43 = arith.constant 0 : index
    %c0_44 = arith.constant 0 : index
    %112 = vector.load %arg10[%c0_43, %c0_44] : memref<32x64xf32, #tpu.memory_space<vmem>>, vector<32x64xf32>
    %cst_45 = arith.constant dense<0.000000e+00> : vector<16x64xf32>
    %113 = tpu.matmul %111, %112, %cst_45 {dimension_numbers = #tpu.dot_dimension_numbers<[1], [0], [0], [1], [0, 0, 1, 1], [], []>} : vector<16x32xf32>, vector<32x64xf32>, vector<16x64xf32> -> vector<16x64xf32>
    %c0_46 = arith.constant 0 : index
    %c0_47 = arith.constant 0 : index
    %114 = vector.load %arg11[%c0_46, %c0_47] : memref<1x64xf32, #tpu.memory_space<vmem>>, vector<1x64xf32>
    %115 = vector.broadcast %114 : vector<1x64xf32> to vector<16x64xf32>
    %116 = arith.addf %113, %115 : vector<16x64xf32>
    %cst_48 = arith.constant 5.000000e-01 : f32
    %117 = vector.broadcast %cst_48 : f32 to vector<16x64xf32>
    %118 = arith.mulf %117, %116 : vector<16x64xf32>
    %cst_49 = arith.constant 4.471500e-02 : f32
    %119 = vector.broadcast %cst_49 : f32 to vector<16x64xf32>
    %120 = arith.mulf %119, %116 : vector<16x64xf32>
    %121 = arith.mulf %120, %116 : vector<16x64xf32>
    %122 = arith.mulf %121, %116 : vector<16x64xf32>
    %123 = arith.addf %116, %122 : vector<16x64xf32>
    %cst_50 = arith.constant 0.797884583 : f32
    %124 = vector.broadcast %cst_50 : f32 to vector<16x64xf32>
    %125 = arith.mulf %124, %123 : vector<16x64xf32>
    %126 = math.tanh %125 : vector<16x64xf32>
    %cst_51 = arith.constant 1.000000e+00 : f32
    %127 = vector.broadcast %cst_51 : f32 to vector<16x64xf32>
    %128 = arith.addf %127, %126 : vector<16x64xf32>
    %129 = arith.mulf %118, %128 : vector<16x64xf32>
    %c0_52 = arith.constant 0 : index
    %c0_53 = arith.constant 0 : index
    %130 = vector.load %arg12[%c0_52, %c0_53] : memref<64x32xf32, #tpu.memory_space<vmem>>, vector<64x32xf32>
    %cst_54 = arith.constant dense<0.000000e+00> : vector<16x32xf32>
    %131 = tpu.matmul %129, %130, %cst_54 {dimension_numbers = #tpu.dot_dimension_numbers<[1], [0], [0], [1], [0, 0, 1, 1], [], []>} : vector<16x64xf32>, vector<64x32xf32>, vector<16x32xf32> -> vector<16x32xf32>
    %c0_55 = arith.constant 0 : index
    %c0_56 = arith.constant 0 : index
    %132 = vector.load %arg13[%c0_55, %c0_56] : memref<1x32xf32, #tpu.memory_space<vmem>>, vector<1x32xf32>
    %133 = vector.broadcast %132 : vector<1x32xf32> to vector<16x32xf32>
    %134 = arith.addf %131, %133 : vector<16x32xf32>
    %135 = arith.addf %111, %134 : vector<16x32xf32>
    %c0_57 = arith.constant 0 : index
    %c0_58 = arith.constant 0 : index
    %136 = vector.load %arg14[%c0_57, %c0_58] : memref<1x32xf32, #tpu.memory_space<vmem>>, vector<1x32xf32>
    %c0_59 = arith.constant 0 : index
    %c0_60 = arith.constant 0 : index
    %137 = vector.load %arg15[%c0_59, %c0_60] : memref<1x32xf32, #tpu.memory_space<vmem>>, vector<1x32xf32>
    %cst_61 = arith.constant dense<0.000000e+00> : vector<16xf32>
    %138 = vector.multi_reduction <add>, %135, %cst_61 [1] : vector<16x32xf32> to vector<16xf32>
    %139 = vector.shape_cast %138 : vector<16xf32> to vector<16x1xf32>
    %cst_62 = arith.constant 3.200000e+01 : f32
    %140 = vector.broadcast %cst_62 : f32 to vector<16x1xf32>
    %141 = arith.divf %139, %140 : vector<16x1xf32>
    %142 = vector.broadcast %141 : vector<16x1xf32> to vector<16x32xf32>
    %143 = arith.subf %135, %142 : vector<16x32xf32>
    %144 = arith.mulf %143, %143 : vector<16x32xf32>
    %cst_63 = arith.constant dense<0.000000e+00> : vector<16xf32>
    %145 = vector.multi_reduction <add>, %144, %cst_63 [1] : vector<16x32xf32> to vector<16xf32>
    %146 = vector.shape_cast %145 : vector<16xf32> to vector<16x1xf32>
    %cst_64 = arith.constant 3.200000e+01 : f32
    %147 = vector.broadcast %cst_64 : f32 to vector<16x1xf32>
    %148 = arith.divf %146, %147 : vector<16x1xf32>
    %149 = vector.broadcast %141 : vector<16x1xf32> to vector<16x32xf32>
    %150 = arith.subf %135, %149 : vector<16x32xf32>
    %cst_65 = arith.constant 9.99999996E-13 : f32
    %151 = vector.broadcast %cst_65 : f32 to vector<16x1xf32>
    %152 = arith.addf %148, %151 : vector<16x1xf32>
    %153 = math.rsqrt %152 : vector<16x1xf32>
    %154 = vector.broadcast %153 : vector<16x1xf32> to vector<16x32xf32>
    %155 = arith.mulf %150, %154 : vector<16x32xf32>
    %156 = vector.broadcast %136 : vector<1x32xf32> to vector<16x32xf32>
    %157 = arith.mulf %155, %156 : vector<16x32xf32>
    %158 = vector.broadcast %137 : vector<1x32xf32> to vector<16x32xf32>
    %159 = arith.addf %157, %158 : vector<16x32xf32>
    %c0_66 = arith.constant 0 : index
    %c0_67 = arith.constant 0 : index
    %160 = vector.load %arg16[%c0_66, %c0_67] : memref<32x96xf32, #tpu.memory_space<vmem>>, vector<32x96xf32>
    %cst_68 = arith.constant dense<0.000000e+00> : vector<16x96xf32>
    %161 = tpu.matmul %159, %160, %cst_68 {dimension_numbers = #tpu.dot_dimension_numbers<[1], [0], [0], [1], [0, 0, 1, 1], [], []>} : vector<16x32xf32>, vector<32x96xf32>, vector<16x96xf32> -> vector<16x96xf32>
    %c0_69 = arith.constant 0 : index
    %c0_70 = arith.constant 0 : index
    %162 = vector.load %arg17[%c0_69, %c0_70] : memref<1x96xf32, #tpu.memory_space<vmem>>, vector<1x96xf32>
    %163 = vector.broadcast %162 : vector<1x96xf32> to vector<16x96xf32>
    %164 = arith.addf %161, %163 : vector<16x96xf32>
    %c0_71 = arith.constant 0 : index
    %c0_72 = arith.constant 0 : index
    %165 = vector.load %arg18[%c0_71, %c0_72] : memref<32x32xf32, #tpu.memory_space<vmem>>, vector<32x32xf32>
    %c0_73 = arith.constant 0 : index
    %c0_74 = arith.constant 0 : index
    %166 = vector.load %arg19[%c0_73, %c0_74] : memref<1x32xf32, #tpu.memory_space<vmem>>, vector<1x32xf32>
    %167 = vector.extract_strided_slice %164 {offsets = [0, 0], sizes = [16, 16], strides = [1, 1]} : vector<16x96xf32> to vector<16x16xf32>
    %cst_75 = arith.constant 2.500000e-01 : f32
    %168 = vector.broadcast %cst_75 : f32 to vector<16x16xf32>
    %169 = arith.mulf %167, %168 : vector<16x16xf32>
    %170 = vector.shape_cast %169 : vector<16x16xf32> to vector<2x8x16xf32>
    %171 = vector.extract_strided_slice %164 {offsets = [0, 32], sizes = [16, 16], strides = [1, 1]} : vector<16x96xf32> to vector<16x16xf32>
    %172 = vector.shape_cast %171 : vector<16x16xf32> to vector<2x8x16xf32>
    %173 = vector.extract_strided_slice %164 {offsets = [0, 64], sizes = [16, 16], strides = [1, 1]} : vector<16x96xf32> to vector<16x16xf32>
    %174 = vector.shape_cast %173 : vector<16x16xf32> to vector<2x8x16xf32>
    "tpu.trace_start"() <{level = 10 : i32, message = "bqd,bkd->bqk"}> : () -> ()
    %cst_76 = arith.constant dense<0.000000e+00> : vector<2x8x8xf32>
    %175 = tpu.matmul %170, %172, %cst_76 {dimension_numbers = #tpu.dot_dimension_numbers<[2], [2], [1], [1], [0, 0, 0, 1, 1, 1], [0], [0]>} : vector<2x8x16xf32>, vector<2x8x16xf32>, vector<2x8x8xf32> -> vector<2x8x8xf32>
    "tpu.trace_stop"() : () -> ()
    %176 = vector.broadcast %0 : vector<2x1x8xf32> to vector<2x8x8xf32>
    %177 = arith.addf %175, %176 : vector<2x8x8xf32>
    %cst_77 = arith.constant dense<0xFF800000> : vector<2x8xf32>
    %178 = vector.multi_reduction <maximumf>, %177, %cst_77 [2] : vector<2x8x8xf32> to vector<2x8xf32>
    %179 = vector.shape_cast %178 : vector<2x8xf32> to vector<2x8x1xf32>
    %180 = vector.broadcast %179 : vector<2x8x1xf32> to vector<2x8x8xf32>
    %181 = arith.subf %177, %180 : vector<2x8x8xf32>
    %182 = math.exp %181 : vector<2x8x8xf32>
    %cst_78 = arith.constant dense<0.000000e+00> : vector<2x8xf32>
    %183 = vector.multi_reduction <add>, %182, %cst_78 [2] : vector<2x8x8xf32> to vector<2x8xf32>
    %184 = vector.shape_cast %183 : vector<2x8xf32> to vector<2x8x1xf32>
    %185 = tpu.reciprocal %184 {approx = true} : vector<2x8x1xf32> -> vector<2x8x1xf32>
    %186 = vector.broadcast %185 : vector<2x8x1xf32> to vector<2x8x8xf32>
    %187 = arith.mulf %182, %186 : vector<2x8x8xf32>
    "tpu.trace_start"() <{level = 10 : i32, message = "bqk,bkd->bqd"}> : () -> ()
    %cst_79 = arith.constant dense<0.000000e+00> : vector<2x8x16xf32>
    %188 = tpu.matmul %187, %174, %cst_79 {dimension_numbers = #tpu.dot_dimension_numbers<[2], [1], [1], [2], [0, 0, 0, 1, 1, 2], [0], [0]>} : vector<2x8x8xf32>, vector<2x8x16xf32>, vector<2x8x16xf32> -> vector<2x8x16xf32>
    "tpu.trace_stop"() : () -> ()
    %189 = vector.shape_cast %188 : vector<2x8x16xf32> to vector<16x16xf32>
    %190 = vector.extract_strided_slice %165 {offsets = [0, 0], sizes = [16, 32], strides = [1, 1]} : vector<32x32xf32> to vector<16x32xf32>
    %cst_80 = arith.constant dense<0.000000e+00> : vector<16x32xf32>
    %191 = tpu.matmul %189, %190, %cst_80 {dimension_numbers = #tpu.dot_dimension_numbers<[1], [0], [0], [1], [0, 0, 1, 1], [], []>} : vector<16x16xf32>, vector<16x32xf32>, vector<16x32xf32> -> vector<16x32xf32>
    %192 = vector.broadcast %166 : vector<1x32xf32> to vector<16x32xf32>
    %193 = arith.addf %192, %191 : vector<16x32xf32>
    %194 = vector.extract_strided_slice %164 {offsets = [0, 16], sizes = [16, 16], strides = [1, 1]} : vector<16x96xf32> to vector<16x16xf32>
    %cst_81 = arith.constant 2.500000e-01 : f32
    %195 = vector.broadcast %cst_81 : f32 to vector<16x16xf32>
    %196 = arith.mulf %194, %195 : vector<16x16xf32>
    %197 = vector.shape_cast %196 : vector<16x16xf32> to vector<2x8x16xf32>
    %198 = vector.extract_strided_slice %164 {offsets = [0, 48], sizes = [16, 16], strides = [1, 1]} : vector<16x96xf32> to vector<16x16xf32>
    %199 = vector.shape_cast %198 : vector<16x16xf32> to vector<2x8x16xf32>
    %200 = vector.extract_strided_slice %164 {offsets = [0, 80], sizes = [16, 16], strides = [1, 1]} : vector<16x96xf32> to vector<16x16xf32>
    %201 = vector.shape_cast %200 : vector<16x16xf32> to vector<2x8x16xf32>
    "tpu.trace_start"() <{level = 10 : i32, message = "bqd,bkd->bqk"}> : () -> ()
    %cst_82 = arith.constant dense<0.000000e+00> : vector<2x8x8xf32>
    %202 = tpu.matmul %197, %199, %cst_82 {dimension_numbers = #tpu.dot_dimension_numbers<[2], [2], [1], [1], [0, 0, 0, 1, 1, 1], [0], [0]>} : vector<2x8x16xf32>, vector<2x8x16xf32>, vector<2x8x8xf32> -> vector<2x8x8xf32>
    "tpu.trace_stop"() : () -> ()
    %203 = vector.broadcast %0 : vector<2x1x8xf32> to vector<2x8x8xf32>
    %204 = arith.addf %202, %203 : vector<2x8x8xf32>
    %cst_83 = arith.constant dense<0xFF800000> : vector<2x8xf32>
    %205 = vector.multi_reduction <maximumf>, %204, %cst_83 [2] : vector<2x8x8xf32> to vector<2x8xf32>
    %206 = vector.shape_cast %205 : vector<2x8xf32> to vector<2x8x1xf32>
    %207 = vector.broadcast %206 : vector<2x8x1xf32> to vector<2x8x8xf32>
    %208 = arith.subf %204, %207 : vector<2x8x8xf32>
    %209 = math.exp %208 : vector<2x8x8xf32>
    %cst_84 = arith.constant dense<0.000000e+00> : vector<2x8xf32>
    %210 = vector.multi_reduction <add>, %209, %cst_84 [2] : vector<2x8x8xf32> to vector<2x8xf32>
    %211 = vector.shape_cast %210 : vector<2x8xf32> to vector<2x8x1xf32>
    %212 = tpu.reciprocal %211 {approx = true} : vector<2x8x1xf32> -> vector<2x8x1xf32>
    %213 = vector.broadcast %212 : vector<2x8x1xf32> to vector<2x8x8xf32>
    %214 = arith.mulf %209, %213 : vector<2x8x8xf32>
    "tpu.trace_start"() <{level = 10 : i32, message = "bqk,bkd->bqd"}> : () -> ()
    %cst_85 = arith.constant dense<0.000000e+00> : vector<2x8x16xf32>
    %215 = tpu.matmul %214, %201, %cst_85 {dimension_numbers = #tpu.dot_dimension_numbers<[2], [1], [1], [2], [0, 0, 0, 1, 1, 2], [0], [0]>} : vector<2x8x8xf32>, vector<2x8x16xf32>, vector<2x8x16xf32> -> vector<2x8x16xf32>
    "tpu.trace_stop"() : () -> ()
    %216 = vector.shape_cast %215 : vector<2x8x16xf32> to vector<16x16xf32>
    %217 = vector.extract_strided_slice %165 {offsets = [16, 0], sizes = [16, 32], strides = [1, 1]} : vector<32x32xf32> to vector<16x32xf32>
    %cst_86 = arith.constant dense<0.000000e+00> : vector<16x32xf32>
    %218 = tpu.matmul %216, %217, %cst_86 {dimension_numbers = #tpu.dot_dimension_numbers<[1], [0], [0], [1], [0, 0, 1, 1], [], []>} : vector<16x16xf32>, vector<16x32xf32>, vector<16x32xf32> -> vector<16x32xf32>
    %219 = arith.addf %193, %218 : vector<16x32xf32>
    %220 = arith.addf %159, %219 : vector<16x32xf32>
    %c0_87 = arith.constant 0 : index
    %c0_88 = arith.constant 0 : index
    %221 = vector.load %arg20[%c0_87, %c0_88] : memref<1x32xf32, #tpu.memory_space<vmem>>, vector<1x32xf32>
    %c0_89 = arith.constant 0 : index
    %c0_90 = arith.constant 0 : index
    %222 = vector.load %arg21[%c0_89, %c0_90] : memref<1x32xf32, #tpu.memory_space<vmem>>, vector<1x32xf32>
    %cst_91 = arith.constant dense<0.000000e+00> : vector<16xf32>
    %223 = vector.multi_reduction <add>, %220, %cst_91 [1] : vector<16x32xf32> to vector<16xf32>
    %224 = vector.shape_cast %223 : vector<16xf32> to vector<16x1xf32>
    %cst_92 = arith.constant 3.200000e+01 : f32
    %225 = vector.broadcast %cst_92 : f32 to vector<16x1xf32>
    %226 = arith.divf %224, %225 : vector<16x1xf32>
    %227 = vector.broadcast %226 : vector<16x1xf32> to vector<16x32xf32>
    %228 = arith.subf %220, %227 : vector<16x32xf32>
    %229 = arith.mulf %228, %228 : vector<16x32xf32>
    %cst_93 = arith.constant dense<0.000000e+00> : vector<16xf32>
    %230 = vector.multi_reduction <add>, %229, %cst_93 [1] : vector<16x32xf32> to vector<16xf32>
    %231 = vector.shape_cast %230 : vector<16xf32> to vector<16x1xf32>
    %cst_94 = arith.constant 3.200000e+01 : f32
    %232 = vector.broadcast %cst_94 : f32 to vector<16x1xf32>
    %233 = arith.divf %231, %232 : vector<16x1xf32>
    %234 = vector.broadcast %226 : vector<16x1xf32> to vector<16x32xf32>
    %235 = arith.subf %220, %234 : vector<16x32xf32>
    %cst_95 = arith.constant 9.99999996E-13 : f32
    %236 = vector.broadcast %cst_95 : f32 to vector<16x1xf32>
    %237 = arith.addf %233, %236 : vector<16x1xf32>
    %238 = math.rsqrt %237 : vector<16x1xf32>
    %239 = vector.broadcast %238 : vector<16x1xf32> to vector<16x32xf32>
    %240 = arith.mulf %235, %239 : vector<16x32xf32>
    %241 = vector.broadcast %221 : vector<1x32xf32> to vector<16x32xf32>
    %242 = arith.mulf %240, %241 : vector<16x32xf32>
    %243 = vector.broadcast %222 : vector<1x32xf32> to vector<16x32xf32>
    %244 = arith.addf %242, %243 : vector<16x32xf32>
    %c0_96 = arith.constant 0 : index
    %c0_97 = arith.constant 0 : index
    %245 = vector.load %arg22[%c0_96, %c0_97] : memref<32x64xf32, #tpu.memory_space<vmem>>, vector<32x64xf32>
    %cst_98 = arith.constant dense<0.000000e+00> : vector<16x64xf32>
    %246 = tpu.matmul %244, %245, %cst_98 {dimension_numbers = #tpu.dot_dimension_numbers<[1], [0], [0], [1], [0, 0, 1, 1], [], []>} : vector<16x32xf32>, vector<32x64xf32>, vector<16x64xf32> -> vector<16x64xf32>
    %c0_99 = arith.constant 0 : index
    %c0_100 = arith.constant 0 : index
    %247 = vector.load %arg23[%c0_99, %c0_100] : memref<1x64xf32, #tpu.memory_space<vmem>>, vector<1x64xf32>
    %248 = vector.broadcast %247 : vector<1x64xf32> to vector<16x64xf32>
    %249 = arith.addf %246, %248 : vector<16x64xf32>
    %cst_101 = arith.constant 5.000000e-01 : f32
    %250 = vector.broadcast %cst_101 : f32 to vector<16x64xf32>
    %251 = arith.mulf %250, %249 : vector<16x64xf32>
    %cst_102 = arith.constant 4.471500e-02 : f32
    %252 = vector.broadcast %cst_102 : f32 to vector<16x64xf32>
    %253 = arith.mulf %252, %249 : vector<16x64xf32>
    %254 = arith.mulf %253, %249 : vector<16x64xf32>
    %255 = arith.mulf %254, %249 : vector<16x64xf32>
    %256 = arith.addf %249, %255 : vector<16x64xf32>
    %cst_103 = arith.constant 0.797884583 : f32
    %257 = vector.broadcast %cst_103 : f32 to vector<16x64xf32>
    %258 = arith.mulf %257, %256 : vector<16x64xf32>
    %259 = math.tanh %258 : vector<16x64xf32>
    %cst_104 = arith.constant 1.000000e+00 : f32
    %260 = vector.broadcast %cst_104 : f32 to vector<16x64xf32>
    %261 = arith.addf %260, %259 : vector<16x64xf32>
    %262 = arith.mulf %251, %261 : vector<16x64xf32>
    %c0_105 = arith.constant 0 : index
    %c0_106 = arith.constant 0 : index
    %263 = vector.load %arg24[%c0_105, %c0_106] : memref<64x32xf32, #tpu.memory_space<vmem>>, vector<64x32xf32>
    %cst_107 = arith.constant dense<0.000000e+00> : vector<16x32xf32>
    %264 = tpu.matmul %262, %263, %cst_107 {dimension_numbers = #tpu.dot_dimension_numbers<[1], [0], [0], [1], [0, 0, 1, 1], [], []>} : vector<16x64xf32>, vector<64x32xf32>, vector<16x32xf32> -> vector<16x32xf32>
    %c0_108 = arith.constant 0 : index
    %c0_109 = arith.constant 0 : index
    %265 = vector.load %arg25[%c0_108, %c0_109] : memref<1x32xf32, #tpu.memory_space<vmem>>, vector<1x32xf32>
    %266 = vector.broadcast %265 : vector<1x32xf32> to vector<16x32xf32>
    %267 = arith.addf %264, %266 : vector<16x32xf32>
    %268 = arith.addf %244, %267 : vector<16x32xf32>
    %c0_110 = arith.constant 0 : index
    %c0_111 = arith.constant 0 : index
    %269 = vector.load %arg26[%c0_110, %c0_111] : memref<1x32xf32, #tpu.memory_space<vmem>>, vector<1x32xf32>
    %c0_112 = arith.constant 0 : index
    %c0_113 = arith.constant 0 : index
    %270 = vector.load %arg27[%c0_112, %c0_113] : memref<1x32xf32, #tpu.memory_space<vmem>>, vector<1x32xf32>
    %cst_114 = arith.constant dense<0.000000e+00> : vector<16xf32>
    %271 = vector.multi_reduction <add>, %268, %cst_114 [1] : vector<16x32xf32> to vector<16xf32>
    %272 = vector.shape_cast %271 : vector<16xf32> to vector<16x1xf32>
    %cst_115 = arith.constant 3.200000e+01 : f32
    %273 = vector.broadcast %cst_115 : f32 to vector<16x1xf32>
    %274 = arith.divf %272, %273 : vector<16x1xf32>
    %275 = vector.broadcast %274 : vector<16x1xf32> to vector<16x32xf32>
    %276 = arith.subf %268, %275 : vector<16x32xf32>
    %277 = arith.mulf %276, %276 : vector<16x32xf32>
    %cst_116 = arith.constant dense<0.000000e+00> : vector<16xf32>
    %278 = vector.multi_reduction <add>, %277, %cst_116 [1] : vector<16x32xf32> to vector<16xf32>
    %279 = vector.shape_cast %278 : vector<16xf32> to vector<16x1xf32>
    %cst_117 = arith.constant 3.200000e+01 : f32
    %280 = vector.broadcast %cst_117 : f32 to vector<16x1xf32>
    %281 = arith.divf %279, %280 : vector<16x1xf32>
    %282 = vector.broadcast %274 : vector<16x1xf32> to vector<16x32xf32>
    %283 = arith.subf %268, %282 : vector<16x32xf32>
    %cst_118 = arith.constant 9.99999996E-13 : f32
    %284 = vector.broadcast %cst_118 : f32 to vector<16x1xf32>
    %285 = arith.addf %281, %284 : vector<16x1xf32>
    %286 = math.rsqrt %285 : vector<16x1xf32>
    %287 = vector.broadcast %286 : vector<16x1xf32> to vector<16x32xf32>
    %288 = arith.mulf %283, %287 : vector<16x32xf32>
    %289 = vector.broadcast %269 : vector<1x32xf32> to vector<16x32xf32>
    %290 = arith.mulf %288, %289 : vector<16x32xf32>
    %291 = vector.broadcast %270 : vector<1x32xf32> to vector<16x32xf32>
    %292 = arith.addf %290, %291 : vector<16x32xf32>
    %293 = vector.shape_cast %292 : vector<16x32xf32> to vector<2x8x32xf32>
    %294 = vector.extract_strided_slice %293 {offsets = [0, 0, 0], sizes = [2, 1, 32], strides = [1, 1, 1]} : vector<2x8x32xf32> to vector<2x1x32xf32>
    %295 = vector.shape_cast %294 : vector<2x1x32xf32> to vector<2x32xf32>
    %c0_119 = arith.constant 0 : index
    %c0_120 = arith.constant 0 : index
    %296 = vector.load %arg28[%c0_119, %c0_120] : memref<32x3xf32, #tpu.memory_space<vmem>>, vector<32x3xf32>
    %cst_121 = arith.constant dense<0.000000e+00> : vector<2x3xf32>
    %297 = tpu.matmul %295, %296, %cst_121 {dimension_numbers = #tpu.dot_dimension_numbers<[1], [0], [0], [1], [0, 0, 1, 1], [], []>} : vector<2x32xf32>, vector<32x3xf32>, vector<2x3xf32> -> vector<2x3xf32>
    %c0_122 = arith.constant 0 : index
    %c0_123 = arith.constant 0 : index
    %298 = vector.load %arg29[%c0_122, %c0_123] : memref<1x3xf32, #tpu.memory_space<vmem>>, vector<1x3xf32>
    %299 = vector.broadcast %298 : vector<1x3xf32> to vector<2x3xf32>
    %300 = arith.addf %297, %299 : vector<2x3xf32>
    %c0_124 = arith.constant 0 : index
    %c0_125 = arith.constant 0 : index
    %301 = vector.load %arg30[%c0_124, %c0_125] : memref<2x3xf32, #tpu.memory_space<vmem>>, vector<2x3xf32>
    tpu.vector_store %arg30[%c0_124, %c0_125], %300 {strides = array<i32>} : memref<2x3xf32, #tpu.memory_space<vmem>>, vector<2x3xf32>,
    return
  }
}

</mosaic_0001>

<bundles_post_ra>
// kernel: sentiment_model_forward.1
= control target key start
LH: loop header
LB: loop body
LE: loop exit
PB: predicated region body
PF: predicated region fallthrough
CT: control target
= control target key end

     0   :  { %s3365_s6 = smov 1   ;;  %s3366_s10 = smov 2   ;;  %s3842_s0 = inlined_call_operand.smem [shape: u32[31], index: -1, kind: input, shape index: {}] }
   0x1   :  { %s3412_s5 = sld [smem:[%s3842_s0]]   ;;  %s3367_s14 = smov 3  }
   0x2   :  { %s3417_s9 = sld [smem:[%s3842_s0 + %s3365_s6]]   ;;  %s3368_s18 = smov 4  }
   0x3   :  { %s3422_s13 = sld [smem:[%s3842_s0 + %s3366_s10]]   ;;  %s3369_s22 = smov 5  }
   0x4   :  { %s3427_s17 = sld [smem:[%s3842_s0 + %s3367_s14]]   ;;  %s3370_s26 = smov 6  }
   0x5   :  { %s3432_s21 = sld [smem:[%s3842_s0 + %s3368_s18]]   ;;  %s3371_s30 = smov 7  }
   0x6   :  { %s3437_s25 = sld [smem:[%s3842_s0 + %s3369_s22]]   ;;  %s3372_s4 = smov 8  }
   0x7   :  { %s3442_s29 = sld [smem:[%s3842_s0 + %s3370_s26]]   ;;  %s3373_s10 = smov 9  }
   0x8   :  { %s3447_s3 = sld [smem:[%s3842_s0 + %s3371_s30]]   ;;  %s3374_s15 = smov 10  }
   0x9   :  { %s3452_s8 = sld [smem:[%s3842_s0 + %s3372_s4]]   ;;  %s3375_s20 = smov 11  }
   0xa   :  { %s3457_s14 = sld [smem:[%s3842_s0 + %s3373_s10]]   ;;  %s3376_s26 = smov 12  }
   0xb   :  { %s3462_s19 = sld [smem:[%s3842_s0 + %s3374_s15]]   ;;  %s3377_s1 = smov 13  }
   0xc   :  { %s3467_s24 = sld [smem:[%s3842_s0 + %s3375_s20]]   ;;  %s3378_s7 = smov 14  }
   0xd   :  { %s3472_s30 = sld [smem:[%s3842_s0 + %s3376_s26]]   ;;  %s3379_s15 = smov 15  }
   0xe   :  { %s3477_s6 = sld [smem:[%s3842_s0 + %s3377_s1]]   ;;  %s3380_s22 = smov 16  }
   0xf   :  { %s3482_s12 = sld [smem:[%s3842_s0 + %s3378_s7]]   ;;  %s3381_s28 = smov 17  }
  0x10   :  { %s3487_s20 = sld [smem:[%s3842_s0 + %s3379_s15]]   ;;  %s3382_s7 = smov 18  }
  0x11   :  { %s3492_s27 = sld [smem:[%s3842_s0 + %s3380_s22]]   ;;  %s3383_s15 = smov 19  }
  0x12   :  { %s3497_s4 = sld [smem:[%s3842_s0 + %s3381_s28]]   ;;  %s3384_s22 = smov 20  }
  0x13   :  { %s3385_s28 = smov 21  }
  0x15   :  { %3847 = sst [smem:[#allocation5_spill]] %s3482_s12 }
  0x16   :  { %3848 = sst [smem:[#allocation6_spill]] %s3487_s20 }
  0x17   :  { %3849 = sst [smem:[#allocation7_spill]] %s3492_s27 }
  0x18   :  { %3850 = sst [smem:[#allocation8_spill]] %s3497_s4 }
  0x19   :  { %s3502_s12 = sld [smem:[%s3842_s0 + %s3382_s7]]   ;;  %s3386_s7 = smov 22  }
  0x1a   :  { %s3507_s20 = sld [smem:[%s3842_s0 + %s3383_s15]]   ;;  %s3387_s15 = smov 23  }
  0x1b   :  { %s3512_s27 = sld [smem:[%s3842_s0 + %s3384_s22]]   ;;  %s3388_s22 = smov 24  }
  0x1c   :  { %s3517_s4 = sld [smem:[%s3842_s0 + %s3385_s28]]   ;;  %s3389_s28 = smov 25  }
  0x1f   :  { %3851 = sst [smem:[#allocation9_spill]] %s3502_s12 }
  0x20   :  { %3852 = sst [smem:[#allocation10_spill]] %s3507_s20 }
  0x21   :  { %3853 = sst [smem:[#allocation11_spill]] %s3512_s27 }
  0x22   :  { %3854 = sst [smem:[#allocation12_spill]] %s3517_s4 }
  0x23   :  { %s3522_s12 = sld [smem:[%s3842_s0 + %s3386_s7]]   ;;  %s3390_s7 = smov 26  }
  0x24   :  { %s3527_s20 = sld [smem:[%s3842_s0 + %s3387_s15]]   ;;  %s3391_s15 = smov 27  }
  0x25   :  { %s3532_s27 = sld [smem:[%s3842_s0 + %s3388_s22]]   ;;  %s3392_s22 = smov 28  }
  0x26   :  { %s3537_s4 = sld [smem:[%s3842_s0 + %s3389_s28]]   ;;  %s3393_s28 = smov 29  }
  0x29   :  { %3855 = sst [smem:[#allocation13_spill]] %s3522_s12 }
  0x2a   :  { %3856 = sst [smem:[#allocation14_spill]] %s3527_s20 }
  0x2b   :  { %3857 = sst [smem:[#allocation15_spill]] %s3532_s27 }
  0x2c   :  { %3858 = sst [smem:[#allocation16_spill]] %s3537_s4 }
  0x2d   :  { %s3542_s12 = sld [smem:[%s3842_s0 + %s3390_s7]]   ;;  %s3394_s7 = smov 30  }
  0x2e   :  { %s3547_s20 = sld [smem:[%s3842_s0 + %s3391_s15]]  }
  0x2f   :  { %s3552_s27 = sld [smem:[%s3842_s0 + %s3392_s22]]  }
  0x30   :  { %s3557_s4 = sld [smem:[%s3842_s0 + %s3393_s28]]  }
  0x33   :  { %3859 = sst [smem:[#allocation17_spill]] %s3542_s12 }
  0x34   :  { %s3562_s12 = sld [smem:[%s3842_s0 + %s3394_s7]]  }
  0x35   :  { %v129_v0 = vld [vmem:[%s3412_s5] sm:$0xff]  ;;  %vm133_vm0 = vcmask 261120   ;;  %v130_v1 = vld [vmem:[%s3412_s5 + $0x8] sm:$0xff] }
  0x36   :  { %66 = vsyncpa [#allocation3], 0  ;;  %v134_v2 = vsel %vm133_vm0, %v129_v0, 0.0  ;;  %v137_v3 = vsel %vm133_vm0, %v130_v1, 0.0  ;;  %v177_v14 = vld [vmem:[%s3432_s21] sm:$0xff]  ;;  %v178_v15 = vld [vmem:[%s3432_s21 + $0x8] sm:$0xff] }
  0x37   :  { %135 = vadd.xlane.f32.xlu0 %v134_v2  ;;  %v179_v16 = vld [vmem:[%s3432_s21 + $0x10] sm:$0xff]  ;;  %v3148_v17 = vpack.c.bf16 %v178_v15, %v177_v14  ;;  %v180_v18 = vld [vmem:[%s3432_s21 + $0x18] sm:$0xff]  ;;  %v2784_v27 = vld [vmem:[%s3422_s13] ss:$0 sm:$0xff]  ;;  %v3395_v36 = vmov 0.0   ;;  %vm3396_vm1 = vmmov 0  }
  0x38   :  { %v3152_v19 = vpack.c.bf16 %v180_v18, %v179_v16  ;;  %v2785_v29 = vld [vmem:[%s3427_s17] ss:$0 sm:$0xff]  ;;  %2958 = vmatprep.subr.mxu1 %v3395_v36  ;;  %2960 = vmatprep.mubr.msk.f32.mxu1 %vm3396_vm1, %v3395_v36  ;;  %s3397_s0 = smov 96   ;;  %vm291_vm2 = vcmask 130048   ;;  %vm445_vm3 = vcmask 64512   ;;  %s3398_s5 = smov 64  }
  0x39   :  { %3149 = vmatprep.subr.bf16.mxu0 %v3148_v17  ;;  %v2786_v37 = vld [vmem:[%s3437_s25] ss:$0 sm:$0xff]  ;;  %v3613_v50 = vld [vmem:[%s3417_s9 + $0x1] ss:$0 sm:$0xff]  ;;  %s3400_s13 = smov 112   ;;  %s3401_s17 = smov 48  }
  0x3a   :  { %3151 = vmatpush3.bf16.msra.mxu0 %v3148_v17  ;;  %v3609_v46 = vld [vmem:[%s3417_s9] ss:$0 sm:$0xff]  ;;  %s3399_s9 = smov 80   ;;  %vm1293_vm4 = vcmask 523264   ;;  %s3860_s21 = sld [smem:[#allocation7_spill]]  ;;  %vm2664_vm5 = vcmask 1041409  }
  0x3b   :  { %138 = vadd.xlane.f32.xlu0 %v137_v3  ;;  %3153 = vmatprep.subr.bf16.mxu0 %v3152_v19  ;;  %v269_v2 = vld [vmem:[%s3442_s29] sm:$0xff]  ;;  %v270_v3 = vld [vmem:[%s3442_s29 + $0x8] sm:$0xff]  ;;  %s3861_s25 = sld [smem:[#allocation5_spill]]  ;;  %s3870_s15 = sld [smem:[#allocation14_spill]]  ;;  %vm2738_vm6 = vcmask 17408  }
  0x3c   :  { %s3871_s16 = sld [smem:[#allocation16_spill]]  ;;  %s3872_s18 = sld [smem:[#allocation17_spill]] }
  0x3e   :  { %3155 = vmatpush3.bf16.msra.mxu0 %v3152_v19 }
  0xc4   :  { %v136_v4 = vpop.xlane.xlu0 %135 }
  0xc5   :  { %v141_v5 = vmul.f32 0.03125, %v136_v4  ;;  %v3156_v4 = vpack.c.bf16 %v270_v3, %v269_v2 }
  0xc7   :  { %v143_v6 = vsub.f32 %v129_v0, %v141_v5  ;;  %3157 = vmatprep.subr.bf16.mxu0 %v3156_v4 }
  0xc8   :  { %v139_v7 = vpop.xlane.xlu0 %138 }
  0xc9   :  { %v142_v8 = vmul.f32 0.03125, %v139_v7  ;;  %v145_v9 = vmul.f32 %v143_v6, %v143_v6 }
  0xcb   :  { %v144_v10 = vsub.f32 %v130_v1, %v142_v8  ;;  %v147_v11 = vsel %vm133_vm0, %v145_v9, 0.0 }
  0xcc   :  { %148 = vadd.xlane.f32.xlu1 %v147_v11 }
  0xcd   :  { %v146_v12 = vmul.f32 %v144_v10, %v144_v10 }
  0xcf   :  { %v150_v13 = vsel %vm133_vm0, %v146_v12, 0.0 }
  0xd0   :  { %151 = vadd.xlane.f32.xlu1 %v150_v13 }
 0x159   :  { %v149_v20 = vpop.xlane.xlu1 %148 }
 0x15a   :  { %v153_v21 = vmul.f32 0.03125, %v149_v20 }
 0x15c   :  { %v155_v22 = vadd.f32 1e-12, %v153_v21 }
 0x15d   :  { %v152_v23 = vpop.xlane.xlu1 %151 }
 0x15e   :  { %3281 = vrsqrt.f32 %v155_v22  ;;  %v154_v24 = vmul.f32 0.03125, %v152_v23 }
 0x160   :  { %v156_v25 = vadd.f32 1e-12, %v154_v24 }
 0x162   :  { %3283 = vrsqrt.f32 %v156_v25 }
 0x168   :  { %v3282_v26 = vpop.eup %3281 }
 0x169   :  { %v159_v28 = vmul.f32 %v3282_v26, %v143_v6 }
 0x16b   :  { %v167_v30 = vmul.f32 %v2784_v27, %v159_v28 }
 0x16c   :  { %v3284_v31 = vpop.eup %3283 }
 0x16d   :  { %v160_v32 = vmul.f32 %v3284_v31, %v144_v10  ;;  %v3576_v33 = vadd.f32 %v2785_v29, %v167_v30 }
 0x16f   :  { %v168_v34 = vmul.f32 %v2784_v27, %v160_v32  ;;  %2955 = vmatprep.mubr.msk.f32.mxu0 %vm133_vm0, %v3576_v33 }
 0x171   :  { %v3580_v35 = vadd.f32 %v2785_v29, %v168_v34 }
 0x173   :  { %2956 = vmatmul.mubr.msk.f32.vlgmr.msra.gmra.mrb[0].mxu0 %vm133_vm0, %v3580_v35 }
 0x174   :  { %3159 = vmatpush3.bf16.msra.mxu0 %v3156_v4 }
 0x175   :  { %2990 = vmatprep.subr.mxu0 %v3395_v36 }
 0x246   :  { %v2957_v38 = vpop.f32.mrb[0].mxu0 }
 0x247   :  { %v3588_v39 = vadd.f32 %v2957_v38, %v2786_v37  ;;  %v260_v40 = vpop.f32.mrb[1].mxu0 }
 0x248   :  { %v3590_v41 = vadd.f32 %v2786_v37, %v260_v40 }
 0x249   :  { %368 = vrot.lane.b32.xlu1 %v3588_v39, %s3397_s0  ;;  %v275_v45 = vmul.f32 0.25, %v3588_v39 }
 0x24a   :  { %289 = vrot.lane.b32.xlu0 %v3590_v41, %s3397_s0  ;;  %v274_v43 = vmul.f32 0.25, %v3590_v41 }
 0x2bb   :  { %v369_v44 = vpop.permute.xlu1 %368 }
 0x2bc   :  { %v290_v42 = vpop.permute.xlu0 %289 }
 0x2bd   :  { %2959 = vmatpush3.xpose.msk.msra.mxu1 %vm291_vm2, %v290_v42 }
 0x2be   :  { %2963 = vmatprep.subr.mxu1 %v3395_v36 }
 0x2c0   :  { %2961 = vmatmul.mubr.msk.f32.vlgmr.msra.gmra.mrb[0].mxu1 %vm291_vm2, %v274_v43 }
 0x2c1   :  { %2964 = vmatpush3.xpose.msk.msra.mxu1 %vm291_vm2, %v369_v44  ;;  %2965 = vmatprep.mubr.msk.f32.mxu1 %vm3396_vm1, %v3395_v36 }
 0x2c2   :  { %2968 = vmatprep.subr.mxu1 %v3395_v36 }
 0x2c4   :  { %2966 = vmatmul.mubr.msk.f32.vlgmr.msra.gmra.mrb[2].mxu1 %vm291_vm2, %v275_v45 }
 0x2c5   :  { %2970 = vmatprep.mubr.msk.f32.mxu1 %vm3396_vm1, %v3395_v36 }
 0x393   :  { %v363_v47 = vpop.f32.mrb[0].mxu1 }
 0x394   :  { %v364_v48 = vadd.f32 %v3609_v46, %v363_v47  ;;  %v2962_v49 = vpop.f32.mrb[1].mxu1 }
 0x396   :  { %v446_v51 = vsel %vm445_vm3, %v364_v48, -inf }
 0x397   :  { %v441_v52 = vpop.f32.mrb[2].mxu1  ;;  %447 = vmax.xlane.f32.xlu1 %v446_v51 }
 0x398   :  { %v442_v53 = vadd.f32 %v3613_v50, %v441_v52  ;;  %v2967_v54 = vpop.f32.mrb[3].mxu1 }
 0x399   :  { %v272_v54 = vld [vmem:[%s3442_s29 + $0x18] sm:$0xff] }
 0x39a   :  { %v449_v55 = vsel %vm445_vm3, %v442_v53, -inf }
 0x39b   :  { %450 = vmax.xlane.f32.xlu0 %v449_v55 }
 0x424   :  { %v448_v56 = vpop.xlane.xlu1 %447 }
 0x425   :  { %v452_v57 = vsub.f32 %v364_v48, %v448_v56 }
 0x427   :  { %v454_v58 = vmul.f32 1.442695, %v452_v57 }
 0x428   :  { %v451_v59 = vpop.xlane.xlu0 %450 }
 0x429   :  { %3285 = vpow2.f32 %v454_v58  ;;  %v453_v60 = vsub.f32 %v442_v53, %v451_v59  ;;  %v271_v53 = vld [vmem:[%s3442_s29 + $0x10] sm:$0xff]  ;;  %v2799_v59 = vld [vmem:[%s3447_s3] ss:$0 sm:$0xff]  ;;  %s3862_s29 = sld [smem:[#allocation6_spill]]  ;;  %s3863_s3 = sld [smem:[#allocation8_spill]] }
 0x42a   :  { %v3160_v55 = vpack.c.bf16 %v272_v54, %v271_v53 }
 0x42b   :  { %v456_v61 = vmul.f32 1.442695, %v453_v60 }
 0x42d   :  { %3287 = vpow2.f32 %v456_v61 }
 0x433   :  { %v3286_v62 = vpop.eup %3285 }
 0x434   :  { %v458_v63 = vsel %vm445_vm3, %v3286_v62, 0.0 }
 0x435   :  { %459 = vadd.xlane.f32.xlu0 %v458_v63 }
 0x437   :  { %v3288_v0 = vpop.eup %3287 }
 0x438   :  { %v461_v1 = vsel %vm445_vm3, %v3288_v0, 0.0 }
 0x439   :  { %462 = vadd.xlane.f32.xlu1 %v461_v1 }
 0x44a   :  { %544 = vrot.lane.b32.xlu1 %v3588_v39, %s3398_s5 }
 0x44b   :  { %468 = vrot.lane.b32.xlu0 %v3590_v41, %s3398_s5 }
 0x44e   :  { %711 = vrot.lane.b32.xlu1 %v3590_v41, %s3399_s9 }
 0x44f   :  { %709 = vrot.lane.b32.xlu0 %v274_v43, %s3400_s13 }
 0x452   :  { %789 = vrot.lane.b32.xlu1 %v3588_v39, %s3399_s9 }
 0x456   :  { %787 = vrot.lane.b32.xlu1 %v275_v45, %s3400_s13 }
 0x4c2   :  { %v460_v5 = vpop.xlane.xlu0 %459 }
 0x4c3   :  { %3289 = vrcp.f32 %v460_v5 }
 0x4c6   :  { %v469_v6 = vpop.permute.xlu0 %468  ;;  %v463_v7 = vpop.xlane.xlu1 %462 }
 0x4c7   :  { %3291 = vrcp.f32 %v463_v7  ;;  %2969 = vmatpush3.msra.mxu1 %v469_v6 }
 0x4c8   :  { %2973 = vmatprep.subr.mxu1 %v3395_v36 }
 0x4ca   :  { %v545_v10 = vpop.permute.xlu1 %544  ;;  %v710_v14 = vpop.permute.xlu0 %709 }
 0x4cd   :  { %v3290_v8 = vpop.eup %3289 }
 0x4ce   :  { %v466_v9 = vmul.f32 %v3290_v8, %v3286_v62  ;;  %v712_v13 = vpop.permute.xlu1 %711 }
 0x4d0   :  { %2971 = vmatmul.mubr.msk.f32.vlgmr.msra.gmra.mrb[4].mxu1 %vm445_vm3, %v466_v9 }
 0x4d1   :  { %v3292_v11 = vpop.eup %3291  ;;  %2974 = vmatpush3.msra.mxu1 %v545_v10  ;;  %2975 = vmatprep.mubr.msk.f32.mxu1 %vm3396_vm1, %v3395_v36 }
 0x4d2   :  { %v467_v12 = vmul.f32 %v3292_v11, %v3288_v0  ;;  %2985 = vmatprep.subr.mxu1 %v3395_v36  ;;  %v790_v17 = vpop.permute.xlu1 %789 }
 0x4d4   :  { %2976 = vmatmul.mubr.msk.f32.vlgmr.msra.gmra.mrb[6].mxu1 %vm445_vm3, %v467_v12  ;;  %v1168_v12 = vld [vmem:[%s3462_s19] sm:$0xff] }
 0x4d5   :  { %2987 = vmatprep.mubr.msk.f32.mxu1 %vm3396_vm1, %v3395_v36 }
 0x4d6   :  { %v788_v20 = vpop.permute.xlu1 %787 }
 0x4d8   :  { %2986 = vmatpush3.xpose.msk.msra.mxu1 %vm291_vm2, %v712_v13  ;;  %v1169_v13 = vld [vmem:[%s3462_s19 + $0x8] sm:$0xff] }
 0x4d9   :  { %2995 = vmatprep.subr.mxu1 %v3395_v36 }
 0x4db   :  { %2988 = vmatmul.mubr.msk.f32.vlgmr.msra.gmra.mrb[8].mxu1 %vm291_vm2, %v710_v14  ;;  %v3164_v14 = vpack.c.bf16 %v1169_v13, %v1168_v12 }
 0x4dc   :  { %2997 = vmatprep.mubr.msk.f32.mxu1 %vm3396_vm1, %v3395_v36 }
 0x5a3   :  { %v540_v15 = vpop.f32.mrb[4].mxu1 }
 0x5a4   :  { %v2972_v16 = vpop.f32.mrb[5].mxu1  ;;  %2982 = vmatprep.mubr.msk.f32.mxu0 %vm291_vm2, %v540_v15  ;;  %v1170_v15 = vld [vmem:[%s3462_s19 + $0x10] sm:$0xff] }
 0x5a5   :  { %v1171_v16 = vld [vmem:[%s3462_s19 + $0x18] sm:$0xff]  ;;  %s3866_s19 = sld [smem:[#allocation13_spill]] }
 0x5a7   :  { %v616_v18 = vpop.f32.mrb[6].mxu1 }
 0x5a8   :  { %v2977_v19 = vpop.f32.mrb[7].mxu1  ;;  %2983 = vmatmul.mubr.msk.f32.vlgmr.msra.gmra.mrb[2].mxu0 %vm291_vm2, %v616_v18 }
 0x5a9   :  { %2991 = vmatpush3.xpose.msk.msra.mxu0 %vm291_vm2, %v790_v17  ;;  %2992 = vmatprep.mubr.msk.f32.mxu0 %vm3396_vm1, %v3395_v36  ;;  %v3168_v17 = vpack.c.bf16 %v1171_v16, %v1170_v15 }
 0x5aa   :  { %3000 = vmatprep.subr.mxu0 %v3395_v36 }
 0x5ac   :  { %2993 = vmatmul.mubr.msk.f32.vlgmr.msra.gmra.mrb[4].mxu0 %vm291_vm2, %v788_v20 }
 0x5ad   :  { %3002 = vmatprep.mubr.msk.f32.mxu0 %vm3396_vm1, %v3395_v36 }
 0x5ae   :  { %v783_v21 = vpop.f32.mrb[8].mxu1 }
 0x5af   :  { %v784_v22 = vadd.f32 %v3609_v46, %v783_v21  ;;  %v2989_v23 = vpop.f32.mrb[9].mxu1 }
 0x5b1   :  { %v865_v24 = vsel %vm445_vm3, %v784_v22, -inf }
 0x5b2   :  { %866 = vmax.xlane.f32.xlu0 %v865_v24 }
 0x63f   :  { %v867_v25 = vpop.xlane.xlu0 %866 }
 0x640   :  { %v871_v26 = vsub.f32 %v784_v22, %v867_v25  ;;  %v2808_v25 = vld [vmem:[%s3452_s8] ss:$0 sm:$0xff]  ;;  %s3864_s8 = sld [smem:[#allocation9_spill]] }
 0x642   :  { %v873_v27 = vmul.f32 1.442695, %v871_v26 }
 0x644   :  { %3293 = vpow2.f32 %v873_v27 }
 0x64e   :  { %v3294_v28 = vpop.eup %3293 }
 0x64f   :  { %v877_v29 = vsel %vm445_vm3, %v3294_v28, 0.0 }
 0x650   :  { %878 = vadd.xlane.f32.xlu0 %v877_v29  ;;  %v2809_v29 = vld [vmem:[%s3457_s14] ss:$0 sm:$0xff]  ;;  %s3865_s14 = sld [smem:[#allocation10_spill]] }
 0x67f   :  { %v861_v30 = vpop.f32.mrb[4].mxu0 }
 0x680   :  { %v862_v31 = vadd.f32 %v3613_v50, %v861_v30  ;;  %v2994_v32 = vpop.f32.mrb[5].mxu0 }
 0x682   :  { %v868_v34 = vsel %vm445_vm3, %v862_v31, -inf }
 0x683   :  { %869 = vmax.xlane.f32.xlu1 %v868_v34 }
 0x694   :  { %963 = vrot.lane.b32.xlu1 %v3588_v39, %s3401_s17 }
 0x6dd   :  { %v879_v45 = vpop.xlane.xlu0 %878 }
 0x710   :  { %v870_v37 = vpop.xlane.xlu1 %869 }
 0x711   :  { %v872_v38 = vsub.f32 %v862_v31, %v870_v37  ;;  %v1278_v37 = vld [vmem:[%s3472_s30] sm:$0xff] }
 0x713   :  { %v875_v40 = vmul.f32 1.442695, %v872_v38  ;;  %v1279_v38 = vld [vmem:[%s3472_s30 + $0x8] sm:$0xff] }
 0x714   :  { %v964_v42 = vpop.permute.xlu1 %963 }
 0x715   :  { %3295 = vpow2.f32 %v875_v40  ;;  %3001 = vmatpush3.msra.mxu0 %v964_v42  ;;  %v3172_v40 = vpack.c.bf16 %v1279_v38, %v1278_v37  ;;  %v1280_v42 = vld [vmem:[%s3472_s30 + $0x10] sm:$0xff] }
 0x716   :  { %3297 = vrcp.f32 %v879_v45  ;;  %3161 = vmatprep.subr.bf16.mxu0 %v3160_v55  ;;  %v1282_v45 = vld [vmem:[%s3472_s30 + $0x20] sm:$0xff] }
 0x71f   :  { %v3296_v43 = vpop.eup %3295 }
 0x720   :  { %v880_v44 = vsel %vm445_vm3, %v3296_v43, 0.0  ;;  %v3298_v48 = vpop.eup %3297 }
 0x721   :  { %881 = vadd.xlane.f32.xlu0 %v880_v44  ;;  %v885_v39 = vmul.f32 %v3298_v48, %v3294_v28 }
 0x737   :  { %887 = vrot.lane.b32.xlu0 %v3590_v41, %s3401_s17 }
 0x7ae   :  { %v882_v47 = vpop.xlane.xlu0 %881 }
 0x7af   :  { %3299 = vrcp.f32 %v882_v47  ;;  %v1283_v47 = vld [vmem:[%s3472_s30 + $0x28] sm:$0xff] }
 0x7b0   :  { %v3180_v48 = vpack.c.bf16 %v1283_v47, %v1282_v45  ;;  %v2816_v45 = vld [vmem:[%s3861_s25] ss:$0 sm:$0xff] }
 0x7b2   :  { %v888_v49 = vpop.permute.xlu0 %887 }
 0x7b3   :  { %2996 = vmatpush3.msra.mxu1 %v888_v49  ;;  %v1285_v49 = vld [vmem:[%s3472_s30 + $0x38] sm:$0xff] }
 0x7b4   :  { %2998 = vmatmul.mubr.msk.f32.vlgmr.msra.gmra.mrb[10].mxu1 %vm445_vm3, %v885_v39  ;;  %3165 = vmatprep.subr.bf16.mxu1 %v3164_v14  ;;  %v1284_v39 = vld [vmem:[%s3472_s30 + $0x30] sm:$0xff] }
 0x7b5   :  { %3167 = vmatpush3.bf16.msra.mxu1 %v3164_v14 }
 0x7b6   :  { %3169 = vmatprep.subr.bf16.mxu1 %v3168_v17 }
 0x7b9   :  { %v3300_v51 = vpop.eup %3299  ;;  %3171 = vmatpush3.bf16.msra.mxu1 %v3168_v17 }
 0x7ba   :  { %v886_v52 = vmul.f32 %v3300_v51, %v3296_v43  ;;  %v1281_v43 = vld [vmem:[%s3472_s30 + $0x18] sm:$0xff]  ;;  %v3184_v51 = vpack.c.bf16 %v1285_v49, %v1284_v39  ;;  %v2817_v49 = vld [vmem:[%s3862_s29] ss:$0 sm:$0xff]  ;;  %s3868_s30 = sld [smem:[#allocation12_spill]] }
 0x7bb   :  { %v3176_v44 = vpack.c.bf16 %v1281_v43, %v1280_v42 }
 0x7bc   :  { %3003 = vmatmul.mubr.msk.f32.vlgmr.msra.gmra.mrb[6].mxu0 %vm445_vm3, %v886_v52  ;;  %v2810_v52 = vld [vmem:[%s3467_s24] ss:$0 sm:$0xff]  ;;  %s3867_s24 = sld [smem:[#allocation11_spill]] }
 0x7bd   :  { %3163 = vmatpush3.bf16.msra.mxu0 %v3160_v55 }
 0x7be   :  { %3173 = vmatprep.subr.bf16.mxu0 %v3172_v40 }
 0x887   :  { %v959_v41 = vpop.f32.mrb[10].mxu1 }
 0x888   :  { %v2999_v56 = vpop.f32.mrb[11].mxu1  ;;  %3009 = vmatprep.mubr.msk.f32.mxu0 %vm291_vm2, %v959_v41 }
 0x88f   :  { %v1035_v57 = vpop.f32.mrb[6].mxu0 }
 0x890   :  { %v3004_v58 = vpop.f32.mrb[7].mxu0  ;;  %3010 = vmatmul.mubr.msk.f32.vlgmr.msra.gmra.mrb[2].mxu0 %vm291_vm2, %v1035_v57 }
 0x891   :  { %3175 = vmatpush3.bf16.msra.mxu0 %v3172_v40 }
 0x892   :  { %3177 = vmatprep.subr.bf16.mxu0 %v3176_v44 }
 0x895   :  { %3179 = vmatpush3.bf16.msra.mxu0 %v3176_v44 }
 0x896   :  { %3181 = vmatprep.subr.bf16.mxu0 %v3180_v48 }
 0x899   :  { %3183 = vmatpush3.bf16.msra.mxu0 %v3180_v48 }
 0x89a   :  { %3185 = vmatprep.subr.bf16.mxu0 %v3184_v51 }
 0x89d   :  { %3187 = vmatpush3.bf16.msra.mxu0 %v3184_v51 }
 0x89e   :  { %3063 = vmatprep.subr.mxu0 %v3395_v36 }
 0x963   :  { %v3011_v60 = vpop.f32.mrb[2].mxu0 }
 0x964   :  { %v3234_v61 = vadd.f32 %v3011_v60, %v2799_v59  ;;  %v1111_v62 = vpop.f32.mrb[3].mxu0 }
 0x965   :  { %v3235_v63 = vadd.f32 %v2799_v59, %v1111_v62 }
 0x966   :  { %v1123_v0 = vadd.f32 %v3234_v61, %v3580_v35 }
 0x967   :  { %v1122_v1 = vadd.f32 %v3235_v63, %v3576_v33 }
 0x968   :  { %v1129_v2 = vsel %vm133_vm0, %v1123_v0, 0.0 }
 0x969   :  { %1130 = vadd.xlane.f32.xlu0 %v1129_v2  ;;  %v1126_v3 = vsel %vm133_vm0, %v1122_v1, 0.0 }
 0x96a   :  { %1127 = vadd.xlane.f32.xlu1 %v1126_v3 }
 0x9f6   :  { %v1131_v4 = vpop.xlane.xlu0 %1130 }
 0x9f7   :  { %v1133_v5 = vmul.f32 0.03125, %v1131_v4  ;;  %v1128_v6 = vpop.xlane.xlu1 %1127 }
 0x9f8   :  { %v1132_v7 = vmul.f32 0.03125, %v1128_v6 }
 0x9f9   :  { %v1135_v8 = vsub.f32 %v1123_v0, %v1133_v5 }
 0x9fa   :  { %v1134_v9 = vsub.f32 %v1122_v1, %v1132_v7 }
 0x9fb   :  { %v1137_v10 = vmul.f32 %v1135_v8, %v1135_v8 }
 0x9fc   :  { %v1136_v35 = vmul.f32 %v1134_v9, %v1134_v9 }
 0x9fd   :  { %v1141_v33 = vsel %vm133_vm0, %v1137_v10, 0.0  ;;  %v2813_v10 = vld [vmem:[%s3477_s6] ss:$0 sm:$0xff]  ;;  %s3869_s6 = sld [smem:[#allocation15_spill]] }
 0x9fe   :  { %1142 = vadd.xlane.f32.xlu1 %v1141_v33  ;;  %v1138_v11 = vsel %vm133_vm0, %v1136_v35, 0.0 }
 0x9ff   :  { %1139 = vadd.xlane.f32.xlu0 %v1138_v11 }
 0xa8b   :  { %v1143_v18 = vpop.xlane.xlu1 %1142 }
 0xa8c   :  { %v1145_v19 = vmul.f32 0.03125, %v1143_v18  ;;  %v1140_v20 = vpop.xlane.xlu0 %1139 }
 0xa8d   :  { %v1144_v21 = vmul.f32 0.03125, %v1140_v20 }
 0xa8e   :  { %v1147_v22 = vadd.f32 1e-12, %v1145_v19 }
 0xa8f   :  { %v1146_v23 = vadd.f32 1e-12, %v1144_v21 }
 0xa90   :  { %3301 = vrsqrt.f32 %v1147_v22 }
 0xa91   :  { %3303 = vrsqrt.f32 %v1146_v23 }
 0xa9a   :  { %v3302_v24 = vpop.eup %3301 }
 0xa9b   :  { %v3304_v26 = vpop.eup %3303  ;;  %v1151_v27 = vmul.f32 %v3302_v24, %v1135_v8 }
 0xa9c   :  { %v1150_v28 = vmul.f32 %v3304_v26, %v1134_v9 }
 0xa9d   :  { %v1159_v30 = vmul.f32 %v2808_v25, %v1151_v27  ;;  %v1421_v27 = vld [vmem:[%s3860_s21] sm:$0xff] }
 0xa9e   :  { %v1158_v31 = vmul.f32 %v2808_v25, %v1150_v28  ;;  %v1422_v28 = vld [vmem:[%s3860_s21 + $0x8] sm:$0xff] }
 0xa9f   :  { %v1167_v34 = vadd.f32 %v2809_v29, %v1159_v30  ;;  %v1423_v30 = vld [vmem:[%s3860_s21 + $0x10] sm:$0xff] }
 0xaa0   :  { %v1166_v32 = vadd.f32 %v2809_v29, %v1158_v31  ;;  %v3188_v29 = vpack.c.bf16 %v1422_v28, %v1421_v27  ;;  %v1424_v31 = vld [vmem:[%s3860_s21 + $0x18] sm:$0xff] }
 0xaa2   :  { %3020 = vmatprep.mubr.msk.f32.mxu1 %vm133_vm0, %v1166_v32  ;;  %3189 = vmatprep.subr.bf16.mxu1 %v3188_v29 }
 0xaa3   :  { %3021 = vmatmul.mubr.msk.f32.vlgmr.msra.gmra.mrb[12].mxu1 %vm133_vm0, %v1167_v34 }
 0xaa4   :  { %3191 = vmatpush3.bf16.msra.mxu1 %v3188_v29 }
 0xb76   :  { %v3022_v53 = vpop.f32.mrb[12].mxu1 }
 0xb77   :  { %v1257_v54 = vadd.f32 %v3022_v53, %v2810_v52  ;;  %v1251_v55 = vpop.f32.mrb[13].mxu1 }
 0xb78   :  { %v1252_v41 = vadd.f32 %v2810_v52, %v1251_v55  ;;  %v2818_v55 = vld [vmem:[%s3863_s3] ss:$0 sm:$0xff] }
 0xb79   :  { %v1263_v56 = vmul.f32 0.044715, %v1257_v54  ;;  %v1261_v7 = vmul.f32 0.5, %v1257_v54 }
 0xb7a   :  { %v1262_v57 = vmul.f32 0.044715, %v1252_v41  ;;  %v1260_v5 = vmul.f32 0.5, %v1252_v41 }
 0xb7b   :  { %v1265_v58 = vmul.f32 %v1263_v56, %v1257_v54 }
 0xb7c   :  { %v1264_v59 = vmul.f32 %v1262_v57, %v1252_v41 }
 0xb7d   :  { %v1267_v60 = vmul.f32 %v1265_v58, %v1257_v54 }
 0xb7e   :  { %v1266_v61 = vmul.f32 %v1264_v59, %v1252_v41 }
 0xb7f   :  { %v1269_v62 = vadd.f32 %v1267_v60, %v1257_v54 }
 0xb80   :  { %v1268_v63 = vadd.f32 %v1266_v61, %v1252_v41 }
 0xb81   :  { %v1271_v0 = vmul.f32 0.7978846, %v1269_v62 }
 0xb82   :  { %v1270_v1 = vmul.f32 0.7978846, %v1268_v63 }
 0xb83   :  { %3305 = vtanh.f32 %v1271_v0 }
 0xb84   :  { %3307 = vtanh.f32 %v1270_v1 }
 0xb8d   :  { %v3306_v2 = vpop.eup %3305 }
 0xb8e   :  { %v3308_v3 = vpop.eup %3307  ;;  %v1275_v4 = vadd.f32 1.0, %v3306_v2 }
 0xb8f   :  { %v1274_v6 = vadd.f32 1.0, %v3308_v3 }
 0xb90   :  { %v1277_v9 = vmul.f32 %v1275_v4, %v1261_v7 }
 0xb91   :  { %v1276_v8 = vmul.f32 %v1274_v6, %v1260_v5 }
 0xb93   :  { %3039 = vmatprep.mubr.msk.f32.mxu0 %vm1293_vm4, %v1276_v8 }
 0xb94   :  { %3040 = vmatmul.mubr.msk.f32.vlgmr.msra.gmra.mrb[8].mxu0 %vm1293_vm4, %v1277_v9 }
 0xb95   :  { %3065 = vmatprep.mubr.msk.f32.mxu0 %vm3396_vm1, %v3395_v36 }
 0xc67   :  { %v3041_v35 = vpop.f32.mrb[8].mxu0 }
 0xc68   :  { %v1372_v33 = vadd.f32 %v3041_v35, %v2813_v10  ;;  %v1366_v11 = vpop.f32.mrb[9].mxu0 }
 0xc69   :  { %v1367_v12 = vadd.f32 %v2813_v10, %v1366_v11 }
 0xc6a   :  { %v1376_v13 = vadd.f32 %v1372_v33, %v1167_v34 }
 0xc6b   :  { %v1375_v14 = vadd.f32 %v1367_v12, %v1166_v32  ;;  %v3192_v32 = vpack.c.bf16 %v1424_v31, %v1423_v30 }
 0xc6c   :  { %v1382_v15 = vsel %vm133_vm0, %v1376_v13, 0.0 }
 0xc6d   :  { %1383 = vadd.xlane.f32.xlu1 %v1382_v15  ;;  %v1379_v16 = vsel %vm133_vm0, %v1375_v14, 0.0  ;;  %3193 = vmatprep.subr.bf16.mxu1 %v3192_v32  ;;  %v1513_v15 = vld [vmem:[%s3864_s8] sm:$0xff] }
 0xc6e   :  { %1380 = vadd.xlane.f32.xlu0 %v1379_v16  ;;  %3195 = vmatpush3.bf16.msra.mxu1 %v3192_v32  ;;  %v1514_v16 = vld [vmem:[%s3864_s8 + $0x8] sm:$0xff] }
 0xc6f   :  { %3053 = vmatprep.subr.mxu1 %v3395_v36 }
 0xcfa   :  { %v1384_v17 = vpop.xlane.xlu1 %1383 }
 0xcfb   :  { %v1386_v18 = vmul.f32 0.03125, %v1384_v17  ;;  %v1381_v19 = vpop.xlane.xlu0 %1380 }
 0xcfc   :  { %v1385_v20 = vmul.f32 0.03125, %v1381_v19 }
 0xcfd   :  { %v1388_v21 = vsub.f32 %v1376_v13, %v1386_v18  ;;  %v3196_v18 = vpack.c.bf16 %v1514_v16, %v1513_v15 }
 0xcfe   :  { %v1387_v22 = vsub.f32 %v1375_v14, %v1385_v20 }
 0xcff   :  { %v1390_v23 = vmul.f32 %v1388_v21, %v1388_v21 }
 0xd00   :  { %v1389_v24 = vmul.f32 %v1387_v22, %v1387_v22 }
 0xd01   :  { %v1394_v25 = vsel %vm133_vm0, %v1390_v23, 0.0 }
 0xd02   :  { %1395 = vadd.xlane.f32.xlu1 %v1394_v25  ;;  %v1391_v26 = vsel %vm133_vm0, %v1389_v24, 0.0 }
 0xd03   :  { %1392 = vadd.xlane.f32.xlu0 %v1391_v26 }
 0xd8f   :  { %v1396_v34 = vpop.xlane.xlu1 %1395 }
 0xd90   :  { %v1398_v37 = vmul.f32 0.03125, %v1396_v34  ;;  %v1393_v38 = vpop.xlane.xlu0 %1392 }
 0xd91   :  { %v1397_v40 = vmul.f32 0.03125, %v1393_v38 }
 0xd92   :  { %v1400_v42 = vadd.f32 1e-12, %v1398_v37 }
 0xd93   :  { %v1399_v43 = vadd.f32 1e-12, %v1397_v40 }
 0xd94   :  { %3309 = vrsqrt.f32 %v1400_v42 }
 0xd95   :  { %3311 = vrsqrt.f32 %v1399_v43 }
 0xd9e   :  { %v3310_v44 = vpop.eup %3309 }
 0xd9f   :  { %v3312_v47 = vpop.eup %3311  ;;  %v1404_v48 = vmul.f32 %v3310_v44, %v1388_v21 }
 0xda0   :  { %v1403_v39 = vmul.f32 %v3312_v47, %v1387_v22 }
 0xda1   :  { %v1412_v51 = vmul.f32 %v2816_v45, %v1404_v48 }
 0xda2   :  { %v1411_v52 = vmul.f32 %v2816_v45, %v1403_v39 }
 0xda3   :  { %v3714_v54 = vadd.f32 %v2817_v49, %v1412_v51 }
 0xda4   :  { %v3712_v53 = vadd.f32 %v2817_v49, %v1411_v52 }
 0xda6   :  { %3050 = vmatprep.mubr.msk.f32.mxu1 %vm133_vm0, %v3712_v53 }
 0xda7   :  { %3051 = vmatmul.mubr.msk.f32.vlgmr.msra.gmra.mrb[14].mxu1 %vm133_vm0, %v3714_v54 }
 0xda8   :  { %3055 = vmatprep.mubr.msk.f32.mxu1 %vm3396_vm1, %v3395_v36 }
 0xe7a   :  { %v3052_v41 = vpop.f32.mrb[14].mxu1 }
 0xe7b   :  { %v3723_v56 = vadd.f32 %v3052_v41, %v2818_v55  ;;  %v1504_v57 = vpop.f32.mrb[15].mxu1 }
 0xe7c   :  { %v3725_v58 = vadd.f32 %v2818_v55, %v1504_v57 }
 0xe7d   :  { %1599 = vrot.lane.b32.xlu1 %v3723_v56, %s3397_s0  ;;  %v1519_v62 = vmul.f32 0.25, %v3723_v56 }
 0xe7e   :  { %1521 = vrot.lane.b32.xlu0 %v3725_v58, %s3397_s0  ;;  %v1518_v60 = vmul.f32 0.25, %v3725_v58 }
 0xeef   :  { %v1600_v61 = vpop.permute.xlu1 %1599 }
 0xef0   :  { %v1522_v59 = vpop.permute.xlu0 %1521 }
 0xef1   :  { %3054 = vmatpush3.xpose.msk.msra.mxu1 %vm291_vm2, %v1522_v59 }
 0xef2   :  { %3058 = vmatprep.subr.mxu1 %v3395_v36 }
 0xef4   :  { %3056 = vmatmul.mubr.msk.f32.vlgmr.msra.gmra.mrb[16].mxu1 %vm291_vm2, %v1518_v60 }
 0xef5   :  { %3059 = vmatpush3.xpose.msk.msra.mxu1 %vm291_vm2, %v1600_v61  ;;  %3060 = vmatprep.mubr.msk.f32.mxu1 %vm3396_vm1, %v3395_v36 }
 0xef6   :  { %3068 = vmatprep.subr.mxu1 %v3395_v36 }
 0xef8   :  { %3061 = vmatmul.mubr.msk.f32.vlgmr.msra.gmra.mrb[18].mxu1 %vm291_vm2, %v1519_v62 }
 0xef9   :  { %3070 = vmatprep.mubr.msk.f32.mxu1 %vm3396_vm1, %v3395_v36 }
 0xfc7   :  { %v1594_v63 = vpop.f32.mrb[16].mxu1 }
 0xfc8   :  { %v1595_v0 = vadd.f32 %v3609_v46, %v1594_v63  ;;  %v3057_v1 = vpop.f32.mrb[17].mxu1 }
 0xfca   :  { %v1676_v2 = vsel %vm445_vm3, %v1595_v0, -inf }
 0xfcb   :  { %1677 = vmax.xlane.f32.xlu1 %v1676_v2  ;;  %v1672_v3 = vpop.f32.mrb[18].mxu1  ;;  %v1515_v2 = vld [vmem:[%s3864_s8 + $0x10] sm:$0xff] }
 0xfcc   :  { %v1673_v4 = vadd.f32 %v3613_v50, %v1672_v3  ;;  %v3062_v5 = vpop.f32.mrb[19].mxu1  ;;  %v1516_v3 = vld [vmem:[%s3864_s8 + $0x18] sm:$0xff] }
 0xfce   :  { %v1679_v6 = vsel %vm445_vm3, %v1673_v4, -inf }
 0xfcf   :  { %1680 = vmax.xlane.f32.xlu0 %v1679_v6 }
0x1058   :  { %v1678_v7 = vpop.xlane.xlu1 %1677 }
0x1059   :  { %v1682_v8 = vsub.f32 %v1595_v0, %v1678_v7 }
0x105b   :  { %v1684_v9 = vmul.f32 1.442695, %v1682_v8  ;;  %v2829_v8 = vld [vmem:[%s3865_s14] ss:$0 sm:$0xff] }
0x105c   :  { %v1681_v10 = vpop.xlane.xlu0 %1680 }
0x105d   :  { %3313 = vpow2.f32 %v1684_v9  ;;  %v1683_v35 = vsub.f32 %v1673_v4, %v1681_v10  ;;  %v3200_v4 = vpack.c.bf16 %v1516_v3, %v1515_v2 }
0x105f   :  { %v1686_v33 = vmul.f32 1.442695, %v1683_v35 }
0x1061   :  { %3315 = vpow2.f32 %v1686_v33 }
0x1067   :  { %v3314_v11 = vpop.eup %3313 }
0x1068   :  { %v1688_v12 = vsel %vm445_vm3, %v3314_v11, 0.0 }
0x1069   :  { %1689 = vadd.xlane.f32.xlu0 %v1688_v12 }
0x106b   :  { %v3316_v13 = vpop.eup %3315 }
0x106c   :  { %v1691_v14 = vsel %vm445_vm3, %v3316_v13, 0.0 }
0x106d   :  { %1692 = vadd.xlane.f32.xlu1 %v1691_v14 }
0x107e   :  { %1774 = vrot.lane.b32.xlu1 %v3723_v56, %s3398_s5 }
0x107f   :  { %1698 = vrot.lane.b32.xlu0 %v3725_v58, %s3398_s5 }
0x1082   :  { %1941 = vrot.lane.b32.xlu1 %v3725_v58, %s3399_s9 }
0x1083   :  { %1939 = vrot.lane.b32.xlu0 %v1518_v60, %s3400_s13 }
0x1086   :  { %2019 = vrot.lane.b32.xlu1 %v3723_v56, %s3399_s9 }
0x108a   :  { %2017 = vrot.lane.b32.xlu1 %v1519_v62, %s3400_s13 }
0x10f6   :  { %v1690_v17 = vpop.xlane.xlu0 %1689 }
0x10f7   :  { %3317 = vrcp.f32 %v1690_v17 }
0x10fa   :  { %v1693_v19 = vpop.xlane.xlu1 %1692  ;;  %v1699_v20 = vpop.permute.xlu0 %1698 }
0x10fb   :  { %3319 = vrcp.f32 %v1693_v19  ;;  %3064 = vmatpush3.msra.mxu0 %v1699_v20 }
0x10fc   :  { %3197 = vmatprep.subr.bf16.mxu0 %v3196_v18 }
0x10fe   :  { %v1775_v21 = vpop.permute.xlu1 %1774  ;;  %v1940_v27 = vpop.permute.xlu0 %1939 }
0x10ff   :  { %3069 = vmatpush3.msra.mxu1 %v1775_v21 }
0x1100   :  { %3080 = vmatprep.subr.mxu1 %v3395_v36 }
0x1101   :  { %v3318_v22 = vpop.eup %3317 }
0x1102   :  { %v1696_v23 = vmul.f32 %v3318_v22, %v3314_v11  ;;  %v1942_v26 = vpop.permute.xlu1 %1941 }
0x1104   :  { %3066 = vmatmul.mubr.msk.f32.vlgmr.msra.gmra.mrb[10].mxu0 %vm445_vm3, %v1696_v23  ;;  %v2398_v23 = vld [vmem:[%s3866_s19] sm:$0xff] }
0x1105   :  { %v3320_v24 = vpop.eup %3319  ;;  %3199 = vmatpush3.bf16.msra.mxu0 %v3196_v18 }
0x1106   :  { %v1697_v25 = vmul.f32 %v3320_v24, %v3316_v13  ;;  %3085 = vmatprep.subr.mxu0 %v3395_v36  ;;  %v2020_v30 = vpop.permute.xlu1 %2019  ;;  %v2399_v24 = vld [vmem:[%s3866_s19 + $0x8] sm:$0xff] }
0x1108   :  { %3071 = vmatmul.mubr.msk.f32.vlgmr.msra.gmra.mrb[20].mxu1 %vm445_vm3, %v1697_v25  ;;  %v3204_v25 = vpack.c.bf16 %v2399_v24, %v2398_v23 }
0x1109   :  { %3081 = vmatpush3.xpose.msk.msra.mxu1 %vm291_vm2, %v1942_v26  ;;  %3082 = vmatprep.mubr.msk.f32.mxu1 %vm3396_vm1, %v3395_v36  ;;  %v2400_v26 = vld [vmem:[%s3866_s19 + $0x10] sm:$0xff] }
0x110a   :  { %3090 = vmatprep.subr.mxu1 %v3395_v36  ;;  %v2018_v34 = vpop.permute.xlu1 %2017 }
0x110c   :  { %3083 = vmatmul.mubr.msk.f32.vlgmr.msra.gmra.mrb[22].mxu1 %vm291_vm2, %v1940_v27  ;;  %v2401_v27 = vld [vmem:[%s3866_s19 + $0x18] sm:$0xff] }
0x110d   :  { %3092 = vmatprep.mubr.msk.f32.mxu1 %vm3396_vm1, %v3395_v36 }
0x11d7   :  { %v1770_v28 = vpop.f32.mrb[10].mxu0 }
0x11d8   :  { %v3067_v29 = vpop.f32.mrb[11].mxu0  ;;  %3077 = vmatprep.mubr.msk.f32.mxu0 %vm291_vm2, %v1770_v28  ;;  %v3208_v28 = vpack.c.bf16 %v2401_v27, %v2400_v26 }
0x11db   :  { %v1846_v31 = vpop.f32.mrb[20].mxu1 }
0x11dc   :  { %v3072_v32 = vpop.f32.mrb[21].mxu1  ;;  %3078 = vmatmul.mubr.msk.f32.vlgmr.msra.gmra.mrb[12].mxu0 %vm291_vm2, %v1846_v31 }
0x11dd   :  { %3086 = vmatpush3.xpose.msk.msra.mxu0 %vm291_vm2, %v2020_v30  ;;  %3087 = vmatprep.mubr.msk.f32.mxu0 %vm3396_vm1, %v3395_v36 }
0x11de   :  { %3095 = vmatprep.subr.mxu0 %v3395_v36 }
0x11df   :  { %v2013_v37 = vpop.f32.mrb[22].mxu1 }
0x11e0   :  { %v2014_v38 = vadd.f32 %v3609_v46, %v2013_v37  ;;  %v3084_v40 = vpop.f32.mrb[23].mxu1  ;;  %3088 = vmatmul.mubr.msk.f32.vlgmr.msra.gmra.mrb[14].mxu0 %vm291_vm2, %v2018_v34 }
0x11e1   :  { %3097 = vmatprep.mubr.msk.f32.mxu0 %vm3396_vm1, %v3395_v36  ;;  %v2838_v40 = vld [vmem:[%s3867_s24] ss:$0 sm:$0xff] }
0x11e2   :  { %v2095_v42 = vsel %vm445_vm3, %v2014_v38, -inf }
0x11e3   :  { %2096 = vmax.xlane.f32.xlu0 %v2095_v42 }
0x1270   :  { %v2097_v43 = vpop.xlane.xlu0 %2096 }
0x1271   :  { %v2101_v44 = vsub.f32 %v2014_v38, %v2097_v43 }
0x1273   :  { %v2103_v45 = vmul.f32 1.442695, %v2101_v44 }
0x1275   :  { %3321 = vpow2.f32 %v2103_v45  ;;  %v2839_v45 = vld [vmem:[%s3868_s30] ss:$0 sm:$0xff] }
0x127f   :  { %v3322_v47 = vpop.eup %3321 }
0x1280   :  { %v2107_v48 = vsel %vm445_vm3, %v3322_v47, 0.0 }
0x1281   :  { %2108 = vadd.xlane.f32.xlu0 %v2107_v48 }
0x12b3   :  { %v2091_v39 = vpop.f32.mrb[14].mxu0 }
0x12b4   :  { %v2092_v46 = vadd.f32 %v3613_v50, %v2091_v39  ;;  %v3089_v49 = vpop.f32.mrb[15].mxu0 }
0x12b5   :  { %v2508_v49 = vld [vmem:[%s3869_s6] sm:$0xff] }
0x12b6   :  { %v2098_v51 = vsel %vm445_vm3, %v2092_v46, -inf }
0x12b7   :  { %2099 = vmax.xlane.f32.xlu1 %v2098_v51  ;;  %v2509_v51 = vld [vmem:[%s3869_s6 + $0x8] sm:$0xff] }
0x12c8   :  { %2193 = vrot.lane.b32.xlu1 %v3723_v56, %s3401_s17 }
0x130e   :  { %v2109_v50 = vpop.xlane.xlu0 %2108 }
0x1344   :  { %v2100_v52 = vpop.xlane.xlu1 %2099 }
0x1345   :  { %v2102_v55 = vsub.f32 %v2092_v46, %v2100_v52  ;;  %v3212_v52 = vpack.c.bf16 %v2509_v51, %v2508_v49 }
0x1347   :  { %v2105_v41 = vmul.f32 1.442695, %v2102_v55  ;;  %v2510_v55 = vld [vmem:[%s3869_s6 + $0x10] sm:$0xff] }
0x1348   :  { %v2194_v57 = vpop.permute.xlu1 %2193 }
0x1349   :  { %3323 = vpow2.f32 %v2105_v41  ;;  %3096 = vmatpush3.msra.mxu0 %v2194_v57  ;;  %v2511_v41 = vld [vmem:[%s3869_s6 + $0x18] sm:$0xff] }
0x134a   :  { %3325 = vrcp.f32 %v2109_v50  ;;  %3201 = vmatprep.subr.bf16.mxu0 %v3200_v4  ;;  %v3216_v57 = vpack.c.bf16 %v2511_v41, %v2510_v55  ;;  %v2846_v41 = vld [vmem:[%s3872_s18] ss:$0 sm:$0xff] }
0x1353   :  { %v3324_v59 = vpop.eup %3323 }
0x1354   :  { %v2110_v60 = vsel %vm445_vm3, %v3324_v59, 0.0  ;;  %v3326_v62 = vpop.eup %3325 }
0x1355   :  { %2111 = vadd.xlane.f32.xlu0 %v2110_v60  ;;  %v2115_v56 = vmul.f32 %v3326_v62, %v3322_v47  ;;  %v2513_v60 = vld [vmem:[%s3869_s6 + $0x28] sm:$0xff]  ;;  %v2515_v62 = vld [vmem:[%s3869_s6 + $0x38] sm:$0xff] }
0x136b   :  { %2117 = vrot.lane.b32.xlu0 %v3725_v58, %s3401_s17 }
0x13e2   :  { %v2112_v61 = vpop.xlane.xlu0 %2111 }
0x13e3   :  { %3327 = vrcp.f32 %v2112_v61  ;;  %v2514_v61 = vld [vmem:[%s3869_s6 + $0x30] sm:$0xff] }
0x13e6   :  { %v2118_v63 = vpop.permute.xlu0 %2117 }
0x13e7   :  { %3091 = vmatpush3.msra.mxu1 %v2118_v63 }
0x13e8   :  { %3093 = vmatmul.mubr.msk.f32.vlgmr.msra.gmra.mrb[24].mxu1 %vm445_vm3, %v2115_v56  ;;  %3205 = vmatprep.subr.bf16.mxu1 %v3204_v25  ;;  %v3224_v56 = vpack.c.bf16 %v2515_v62, %v2514_v61 }
0x13e9   :  { %3207 = vmatpush3.bf16.msra.mxu1 %v3204_v25 }
0x13ea   :  { %3209 = vmatprep.subr.bf16.mxu1 %v3208_v28 }
0x13ed   :  { %v3328_v0 = vpop.eup %3327  ;;  %3211 = vmatpush3.bf16.msra.mxu1 %v3208_v28 }
0x13ee   :  { %v2116_v1 = vmul.f32 %v3328_v0, %v3324_v59  ;;  %v2512_v59 = vld [vmem:[%s3869_s6 + $0x20] sm:$0xff] }
0x13ef   :  { %v3220_v50 = vpack.c.bf16 %v2513_v60, %v2512_v59 }
0x13f0   :  { %3098 = vmatmul.mubr.msk.f32.vlgmr.msra.gmra.mrb[16].mxu0 %vm445_vm3, %v2116_v1 }
0x13f1   :  { %3203 = vmatpush3.bf16.msra.mxu0 %v3200_v4 }
0x13f2   :  { %3213 = vmatprep.subr.bf16.mxu0 %v3212_v52 }
0x14bb   :  { %v2189_v58 = vpop.f32.mrb[24].mxu1 }
0x14bc   :  { %v3094_v5 = vpop.f32.mrb[25].mxu1  ;;  %3104 = vmatprep.mubr.msk.f32.mxu0 %vm291_vm2, %v2189_v58 }
0x14c3   :  { %v2265_v6 = vpop.f32.mrb[16].mxu0 }
0x14c4   :  { %v3099_v7 = vpop.f32.mrb[17].mxu0  ;;  %3105 = vmatmul.mubr.msk.f32.vlgmr.msra.gmra.mrb[12].mxu0 %vm291_vm2, %v2265_v6 }
0x14c5   :  { %3215 = vmatpush3.bf16.msra.mxu0 %v3212_v52 }
0x14c6   :  { %3217 = vmatprep.subr.bf16.mxu0 %v3216_v57 }
0x14c9   :  { %3219 = vmatpush3.bf16.msra.mxu0 %v3216_v57 }
0x14ca   :  { %3221 = vmatprep.subr.bf16.mxu0 %v3220_v50 }
0x14cd   :  { %3223 = vmatpush3.bf16.msra.mxu0 %v3220_v50  ;;  %v2847_v50 = vld [vmem:[%s3547_s20] ss:$0 sm:$0xff] }
0x14ce   :  { %3225 = vmatprep.subr.bf16.mxu0 %v3224_v56 }
0x14d1   :  { %3227 = vmatpush3.bf16.msra.mxu0 %v3224_v56 }
0x1597   :  { %v3106_v9 = vpop.f32.mrb[12].mxu0 }
0x1598   :  { %v3236_v10 = vadd.f32 %v3106_v9, %v2829_v8  ;;  %v2341_v35 = vpop.f32.mrb[13].mxu0 }
0x1599   :  { %v3237_v33 = vadd.f32 %v2829_v8, %v2341_v35 }
0x159a   :  { %v2353_v11 = vadd.f32 %v3236_v10, %v3714_v54 }
0x159b   :  { %v2352_v12 = vadd.f32 %v3237_v33, %v3712_v53 }
0x159c   :  { %v2359_v13 = vsel %vm133_vm0, %v2353_v11, 0.0 }
0x159d   :  { %2360 = vadd.xlane.f32.xlu0 %v2359_v13  ;;  %v2356_v14 = vsel %vm133_vm0, %v2352_v12, 0.0 }
0x159e   :  { %2357 = vadd.xlane.f32.xlu1 %v2356_v14 }
0x162a   :  { %v2361_v15 = vpop.xlane.xlu0 %2360 }
0x162b   :  { %v2363_v16 = vmul.f32 0.03125, %v2361_v15  ;;  %v2358_v17 = vpop.xlane.xlu1 %2357 }
0x162c   :  { %v2362_v18 = vmul.f32 0.03125, %v2358_v17 }
0x162d   :  { %v2365_v19 = vsub.f32 %v2353_v11, %v2363_v16 }
0x162e   :  { %v2364_v20 = vsub.f32 %v2352_v12, %v2362_v18  ;;  %v2843_v18 = vld [vmem:[%s3871_s16] ss:$0 sm:$0xff] }
0x162f   :  { %v2367_v21 = vmul.f32 %v2365_v19, %v2365_v19 }
0x1630   :  { %v2366_v54 = vmul.f32 %v2364_v20, %v2364_v20 }
0x1631   :  { %v2371_v53 = vsel %vm133_vm0, %v2367_v21, 0.0 }
0x1632   :  { %2372 = vadd.xlane.f32.xlu1 %v2371_v53  ;;  %v2368_v22 = vsel %vm133_vm0, %v2366_v54, 0.0 }
0x1633   :  { %2369 = vadd.xlane.f32.xlu0 %v2368_v22 }
0x16bf   :  { %v2373_v29 = vpop.xlane.xlu1 %2372 }
0x16c0   :  { %v2375_v30 = vmul.f32 0.03125, %v2373_v29  ;;  %v2370_v31 = vpop.xlane.xlu0 %2369 }
0x16c1   :  { %v2374_v32 = vmul.f32 0.03125, %v2370_v31 }
0x16c2   :  { %v2377_v34 = vadd.f32 1e-12, %v2375_v30 }
0x16c3   :  { %v2376_v37 = vadd.f32 1e-12, %v2374_v32 }
0x16c4   :  { %3329 = vrsqrt.f32 %v2377_v34 }
0x16c5   :  { %3331 = vrsqrt.f32 %v2376_v37 }
0x16ce   :  { %v3330_v38 = vpop.eup %3329 }
0x16cf   :  { %v3332_v42 = vpop.eup %3331  ;;  %v2381_v43 = vmul.f32 %v3330_v38, %v2365_v19  ;;  %v2650_v38 = vld [vmem:[%s3552_s27] sm:$0xff] }
0x16d0   :  { %v2380_v44 = vmul.f32 %v3332_v42, %v2364_v20 }
0x16d1   :  { %v2389_v47 = vmul.f32 %v2838_v40, %v2381_v43  ;;  %v2652_v43 = vld [vmem:[%s3552_s27 + $0x10] sm:$0xff] }
0x16d2   :  { %v2388_v48 = vmul.f32 %v2838_v40, %v2380_v44  ;;  %v2651_v40 = vld [vmem:[%s3552_s27 + $0x8] sm:$0xff]  ;;  %v2653_v44 = vld [vmem:[%s3552_s27 + $0x18] sm:$0xff]  ;;  %s3403_s27 = smov [#allocation2]  }
0x16d3   :  { %v2397_v46 = vadd.f32 %v2839_v45, %v2389_v47  ;;  %v3229_v42 = vpack.c.bf16 %v2651_v40, %v2650_v38  ;;  %v3232_v47 = vpack.c.bf16 %v2653_v44, %v2652_v43  ;;  %s2746_s22 = sshll.u32 %s3403_s27, 4  ;;  %s2747_s22 = int_to_ptr.vmem [resolvable:$true] %s2746_s22 }
0x16d4   :  { %v2396_v39 = vadd.f32 %v2839_v45, %v2388_v48  ;;  %v3402_v45 = vmov 0.0|0.0   ;;  %s3341_s23 = scalar_lea.vmem %s2747_s22, 32  ;;  %p3346_p1 = scmp.lt.s32.totalorder %s2747_s22, %s2747_s22 }
0x16d5   :  { %3228 = vmatprep.subr.bf16.mxu1 %v3402_v45  ;;  %p3342_p0 = scmp.ne.s32.totalorder %s2747_s22, %s3341_s23  ;;  %p3347_p2 = scmp.lt.s32.totalorder %s3341_s23, %s3341_s23 }
0x16d6   :  { %3115 = vmatprep.mubr.msk.f32.mxu1 %vm133_vm0, %v2396_v39 }
0x16d7   :  { %3116 = vmatmul.mubr.msk.f32.vlgmr.msra.gmra.mrb[26].mxu1 %vm133_vm0, %v2397_v46  ;;  %p3348_p3 = por %p3347_p2, %p3346_p1 }
0x16d8   :  { %3145 = vmatprep.mubr.msk.f32.mxu1 %vm3396_vm1, %v3395_v36  ;;  %v2840_v36 = vld [vmem:[%s3870_s15] ss:$0 sm:$0xff]  ;;  %3230 = vmatpush3.bf16.msra.mxu1 %v3229_v42 }
0x16d9   :  { %3231 = vmatprep.subr.bf16.mxu1 %v3402_v45  ;;  %p3349_p4 = pnand %p3348_p3, %p3342_p0 }
0x16dc   :  { %3233 = vmatpush3.bf16.msra.mxu1 %v3232_v47 }
0x17aa   :  { %v3117_v63 = vpop.f32.mrb[26].mxu1 }
0x17ab   :  { %v2487_v0 = vadd.f32 %v3117_v63, %v2840_v36  ;;  %v2481_v1 = vpop.f32.mrb[27].mxu1 }
0x17ac   :  { %v2482_v2 = vadd.f32 %v2840_v36, %v2481_v1  ;;  %v2848_v1 = vld [vmem:[%s3557_s4] ss:$0 sm:$0xff] }
0x17ad   :  { %v2493_v3 = vmul.f32 0.044715, %v2487_v0  ;;  %v2491_v15 = vmul.f32 0.5, %v2487_v0 }
0x17ae   :  { %v2492_v4 = vmul.f32 0.044715, %v2482_v2  ;;  %v2490_v13 = vmul.f32 0.5, %v2482_v2 }
0x17af   :  { %v2495_v58 = vmul.f32 %v2493_v3, %v2487_v0 }
0x17b0   :  { %v2494_v5 = vmul.f32 %v2492_v4, %v2482_v2 }
0x17b1   :  { %v2497_v6 = vmul.f32 %v2495_v58, %v2487_v0 }
0x17b2   :  { %v2496_v7 = vmul.f32 %v2494_v5, %v2482_v2 }
0x17b3   :  { %v2499_v8 = vadd.f32 %v2497_v6, %v2487_v0 }
0x17b4   :  { %v2498_v9 = vadd.f32 %v2496_v7, %v2482_v2 }
0x17b5   :  { %v2501_v10 = vmul.f32 0.7978846, %v2499_v8 }
0x17b6   :  { %v2500_v35 = vmul.f32 0.7978846, %v2498_v9 }
0x17b7   :  { %3333 = vtanh.f32 %v2501_v10 }
0x17b8   :  { %3335 = vtanh.f32 %v2500_v35 }
0x17c1   :  { %v3334_v33 = vpop.eup %3333 }
0x17c2   :  { %v3336_v11 = vpop.eup %3335  ;;  %v2505_v12 = vadd.f32 1.0, %v3334_v33 }
0x17c3   :  { %v2504_v14 = vadd.f32 1.0, %v3336_v11 }
0x17c4   :  { %v2507_v17 = vmul.f32 %v2505_v12, %v2491_v15 }
0x17c5   :  { %v2506_v16 = vmul.f32 %v2504_v14, %v2490_v13 }
0x17c7   :  { %3134 = vmatprep.mubr.msk.f32.mxu0 %vm1293_vm4, %v2506_v16 }
0x17c8   :  { %3135 = vmatmul.mubr.msk.f32.vlgmr.msra.gmra.mrb[18].mxu0 %vm1293_vm4, %v2507_v17 }
0x189b   :  { %v3136_v19 = vpop.f32.mrb[18].mxu0 }
0x189c   :  { %v2601_v20 = vadd.f32 %v3136_v19, %v2843_v18  ;;  %v2595_v21 = vpop.f32.mrb[19].mxu0 }
0x189d   :  { %v2596_v54 = vadd.f32 %v2843_v18, %v2595_v21 }
0x189e   :  { %v2605_v53 = vadd.f32 %v2601_v20, %v2397_v46 }
0x189f   :  { %v2604_v22 = vadd.f32 %v2596_v54, %v2396_v39 }
0x18a0   :  { %v2611_v23 = vsel %vm133_vm0, %v2605_v53, 0.0 }
0x18a1   :  { %2612 = vadd.xlane.f32.xlu0 %v2611_v23  ;;  %v2608_v24 = vsel %vm133_vm0, %v2604_v22, 0.0 }
0x18a2   :  { %2609 = vadd.xlane.f32.xlu1 %v2608_v24 }
0x192e   :  { %v2613_v25 = vpop.xlane.xlu0 %2612 }
0x192f   :  { %v2615_v26 = vmul.f32 0.03125, %v2613_v25  ;;  %v2610_v27 = vpop.xlane.xlu1 %2609 }
0x1930   :  { %v2614_v28 = vmul.f32 0.03125, %v2610_v27 }
0x1931   :  { %v2617_v29 = vsub.f32 %v2605_v53, %v2615_v26 }
0x1932   :  { %v2616_v30 = vsub.f32 %v2604_v22, %v2614_v28 }
0x1933   :  { %v2619_v31 = vmul.f32 %v2617_v29, %v2617_v29 }
0x1934   :  { %v2618_v32 = vmul.f32 %v2616_v30, %v2616_v30 }
0x1935   :  { %v2623_v34 = vsel %vm133_vm0, %v2619_v31, 0.0 }
0x1936   :  { %2624 = vadd.xlane.f32.xlu0 %v2623_v34  ;;  %v2620_v37 = vsel %vm133_vm0, %v2618_v32, 0.0 }
0x1937   :  { %2621 = vadd.xlane.f32.xlu1 %v2620_v37 }
0x19c3   :  { %v2625_v48 = vpop.xlane.xlu0 %2624 }
0x19c4   :  { %v2627_v39 = vmul.f32 0.03125, %v2625_v48  ;;  %v2622_v46 = vpop.xlane.xlu1 %2621 }
0x19c5   :  { %v2626_v49 = vmul.f32 0.03125, %v2622_v46 }
0x19c6   :  { %v2629_v51 = vadd.f32 1e-12, %v2627_v39 }
0x19c7   :  { %v2628_v52 = vadd.f32 1e-12, %v2626_v49 }
0x19c8   :  { %3337 = vrsqrt.f32 %v2629_v51 }
0x19c9   :  { %3339 = vrsqrt.f32 %v2628_v52 }
0x19d2   :  { %v3338_v55 = vpop.eup %3337 }
0x19d3   :  { %v3340_v57 = vpop.eup %3339  ;;  %v2633_v59 = vmul.f32 %v3338_v55, %v2617_v29 }
0x19d4   :  { %v2632_v60 = vmul.f32 %v3340_v57, %v2616_v30 }
0x19d5   :  { %v2641_v61 = vmul.f32 %v2846_v41, %v2633_v59 }
0x19d6   :  { %v2640_v62 = vmul.f32 %v2846_v41, %v2632_v60 }
0x19d7   :  { %v2649_v56 = vadd.f32 %v2847_v50, %v2641_v61 }
0x19d8   :  { %v2648_v36 = vadd.f32 %v2847_v50, %v2640_v62 }
0x19d9   :  { %v2663_v63 = vrot.slane %v2649_v56, 7 }
0x19db   :  { %v2665_v0 = vsel %vm2664_vm5, %v2663_v63, %v2648_v36 }
0x19dc   :  { %3146 = vmatmul.mubr.msk.f32.vlgmr.msra.gmra.mrb[28].mxu1 %vm133_vm0, %v2665_v0 }
0x1aaf   :  { %v2734_v2 = vpop.f32.mrb[28].mxu1 }
0x1ab0   :  { %v2735_v3 = vadd.f32 %v2848_v1, %v2734_v2  ;;  %v3147_v4 = vpop.f32.mrb[29].mxu1 }
0x1ab2   :  { %2739 = vst.msk [vmem:[#allocation2] sm:$0x3] %vm2738_vm6, %v2735_v3 }
0x1ab3   :  { %3352 = shalt.err (!%p3349_p4)
}
0x1ab4   :  { %s3353_s20 = scalar_lea.hbm %s3562_s12, 32 }
0x1ab5   :  { %p3354_p5 = scmp.ne.s32.totalorder %s3562_s12, %s3353_s20  ;;  %p3357_p6 = scmp.lt.u32.totalorder %s3353_s20, %s3562_s12 }
0x1ab7   :  { %p3359_p7 = pnand %p3357_p6, %p3354_p5 }
0x1ab9   :  { %3362 = shalt.err (!%p3359_p7)
}
0x1aba   :  { %2749 = dma.vmem_to_hbm [thread:$0]  %s2747_s22, 32, %s3562_s12, [#allocation3]  }
0x1abb   :  { %3363 = dma.done.wait [#allocation3], 32  }
0x1abc   :  { %3364 = vsyncadd [#allocation3], 4294967264 }
0x1abd   :  { %2753 = vsyncpa [#allocation3], 1 }

</bundles_post_ra>
